<compile_context>
chip_gen: v5e
topology: v5e:2x2
jax: 0.10.0
libtpu: 0.0.40
codegen_flags: <defaults>
</compile_context>

<pallas_src>
import jax
import jax.numpy as jnp
from jax import lax
from jax.experimental import pallas as pl
from jax.experimental.pallas import tpu as pltpu


def _round_up(a, b):
    return ((a + b - 1) // b) * b


# ---------------------------------------------------------------- kernels ---
def _conv3x3_relu_kernel(H, W, Cin, Cout):
    """One padded NHWC image per grid step; 9 fused taps, bias+ReLU fused."""
    def kernel(x_ref, w_ref, b_ref, o_ref):
        # x_ref: (1, H+2, W+2, Cin) f32 | w_ref: (3, 3, Cin, Cout) bf16
        # b_ref: (1, Cout) f32         | o_ref: (1, H, W, Cout) f32
        bias = b_ref[...]                                     # (1, Cout)

        def row(h, carry):
            acc = jnp.zeros((W, Cout), jnp.float32)
            for dy in range(3):
                for dx in range(3):
                    lhs = x_ref[0, h + dy, pl.ds(dx, W), :]   # (W, Cin)
                    wk = w_ref[dy, dx]                        # (Cin, Cout) bf16
                    if Cin == 1:
                        # K=1 contraction: cheaper as a VPU broadcast-multiply.
                        acc = acc + lhs * wk.astype(jnp.float32)
                    else:
                        acc = acc + jnp.dot(lhs.astype(jnp.bfloat16), wk,
                                            preferred_element_type=jnp.float32)
            o_ref[0, h] = jnp.maximum(acc + bias, 0.0).astype(o_ref.dtype)
            return carry

        lax.fori_loop(0, H, row, 0)
    return kernel


def _pool2x2_kernel(C):
    """x_ref: (tm, 2, Wo, 2*C) -> o_ref: (tm, Wo, C); 2x2 max done in-kernel."""
    def kernel(x_ref, o_ref):
        x = x_ref[...]                              # (tm, 2, Wo, 2C)
        rm = jnp.maximum(x[:, 0], x[:, 1])          # max over the two rows
        o_ref[...] = jnp.maximum(rm[:, :, :C], rm[:, :, C:])   # max over the two cols
    return kernel


def _fc_head_kernel(a_ref, w1_ref, b1_ref, w2_ref, b2_ref, o_ref):
    """Fused fc1(+ReLU) -> fc2 on one M-tile. Weights bf16, accumulation f32."""
    h = jnp.dot(a_ref[...].astype(jnp.bfloat16), w1_ref[...],
                preferred_element_type=jnp.float32)
    h = jnp.maximum(h + b1_ref[...], 0.0)
    o = jnp.dot(h.astype(jnp.bfloat16), w2_ref[...],
                preferred_element_type=jnp.float32) + b2_ref[...]
    o_ref[...] = o.astype(o_ref.dtype)


# --------------------------------------------------------------- wrappers ---
def conv3x3_relu_nhwc(x, w_bf16, b):
    """x: (N, H, W, Cin) f32, w_bf16: (3, 3, Cin, Cout) bf16, b: (1, Cout) f32."""
    N, H, W, Cin = x.shape
    Cout = w_bf16.shape[-1]
    xp = jnp.pad(x, ((0, 0), (1, 1), (1, 1), (0, 0)))          # ~1.15x, not 9x
    return pl.pallas_call(
        _conv3x3_relu_kernel(H, W, Cin, Cout),
        out_shape=jax.ShapeDtypeStruct((N, H, W, Cout), jnp.float32),
        grid=(N,),
        in_specs=[pl.BlockSpec((1, H + 2, W + 2, Cin), lambda n: (n, 0, 0, 0)),
                  pl.BlockSpec((3, 3, Cin, Cout), lambda n: (0, 0, 0, 0)),
                  pl.BlockSpec((1, Cout), lambda n: (0, 0))],
        out_specs=pl.BlockSpec((1, H, W, Cout), lambda n: (n, 0, 0, 0)),
        compiler_params=pltpu.CompilerParams(dimension_semantics=("parallel",)),
    )(xp, w_bf16, b)


def maxpool2x2_nhwc(x):
    """x: (N, H, W, C) NHWC -> (N, H//2, W//2, C). Single read, in-kernel 2x2 max."""
    N, H, W, C = x.shape
    Ho, Wo = H // 2, W // 2
    R = N * Ho
    xr = x.reshape(R, 2, Wo, 2 * C)                # free contiguous reshape
    tm = min(128, _round_up(R, 8))                 # small blocks: safe on v7x 64MiB VMEM
    Rp = _round_up(R, tm)
    if Rp != R:
        xr = jnp.pad(xr, ((0, Rp - R), (0, 0), (0, 0), (0, 0)))
    out = pl.pallas_call(
        _pool2x2_kernel(C),
        out_shape=jax.ShapeDtypeStruct((Rp, Wo, C), x.dtype),
        grid=(Rp // tm,),
        in_specs=[pl.BlockSpec((tm, 2, Wo, 2 * C), lambda i: (i, 0, 0, 0))],
        out_specs=pl.BlockSpec((tm, Wo, C), lambda i: (i, 0, 0)),
        compiler_params=pltpu.CompilerParams(dimension_semantics=("parallel",)),
    )(xr)
    if Rp != R:
        out = out[:R]
    return out.reshape(N, Ho, Wo, C)


def fc_head(a, w1_bf16, b1, w2_bf16, b2, *, tm_max=128):
    """Fused fc1+ReLU+fc2.  a:(M,K1) f32, w1:(K1,H) bf16, w2:(H,O) bf16."""
    M, K1 = a.shape
    H = w1_bf16.shape[1]
    O = w2_bf16.shape[1]
    assert w1_bf16.shape[0] == K1 and w2_bf16.shape[0] == H
    tm = min(tm_max, _round_up(M, 8))
    Mp = _round_up(M, tm)
    if Mp != M:
        a = jnp.pad(a, ((0, Mp - M), (0, 0)))
    out = pl.pallas_call(
        _fc_head_kernel,
        out_shape=jax.ShapeDtypeStruct((Mp, O), jnp.float32),
        grid=(Mp // tm,),
        in_specs=[pl.BlockSpec((tm, K1), lambda i: (i, 0)),
                  pl.BlockSpec((K1, H), lambda i: (0, 0)),
                  pl.BlockSpec((1, H), lambda i: (0, 0)),
                  pl.BlockSpec((H, O), lambda i: (0, 0)),
                  pl.BlockSpec((1, O), lambda i: (0, 0))],
        out_specs=pl.BlockSpec((tm, O), lambda i: (i, 0)),
        compiler_params=pltpu.CompilerParams(dimension_semantics=("parallel",)),
    )(a, w1_bf16, b1.reshape(1, H), w2_bf16, b2.reshape(1, O))
    return out[:M] if Mp != M else out


# ------------------------------------------------------------------ model ---
def init_params(key):
    """PyTorch-layout parameters (same shapes / flatten order as SimpleCNN)."""
    ks = jax.random.split(key, 8)
    def u(k, shape, fan_in):
        bound = 1.0 / jnp.sqrt(jnp.float32(fan_in))
        return jax.random.uniform(k, shape, jnp.float32, -bound, bound)
    return {
        "conv1_w": u(ks[0], (16, 1, 3, 3), 1 * 9),
        "conv1_b": u(ks[1], (16,), 1 * 9),
        "conv2_w": u(ks[2], (32, 16, 3, 3), 16 * 9),
        "conv2_b": u(ks[3], (32,), 16 * 9),
        "fc1_w":   u(ks[4], (128, 32 * 7 * 7), 32 * 7 * 7),   # torch order: (out, c*49+h*7+w)
        "fc1_b":   u(ks[5], (128,), 32 * 7 * 7),
        "fc2_w":   u(ks[6], (10, 128), 128),
        "fc2_b":   u(ks[7], (10,), 128),
    }


def prepare_params(p):
    """One-time conversion of torch-layout params into kernel-friendly layout."""
    fc1 = (p["fc1_w"].reshape(128, 32, 7, 7)        # (out, c, h, w)
           .transpose(2, 3, 1, 0)                   # (h, w, c, out) = NHWC flatten order
           .reshape(32 * 7 * 7, 128))
    return {
        "conv1_w": jnp.transpose(p["conv1_w"], (2, 3, 1, 0)).astype(jnp.bfloat16),  # (3,3,1,16)
        "conv1_b": p["conv1_b"].reshape(1, -1),
        "conv2_w": jnp.transpose(p["conv2_w"], (2, 3, 1, 0)).astype(jnp.bfloat16),  # (3,3,16,32)
        "conv2_b": p["conv2_b"].reshape(1, -1),
        "fc1_w":   fc1.astype(jnp.bfloat16),        # (1568, 128), pre-permuted for NHWC
        "fc1_b":   p["fc1_b"],
        "fc2_w":   p["fc2_w"].T.astype(jnp.bfloat16),   # (128, 10), pre-transposed
        "fc2_b":   p["fc2_b"],
    }


def simple_cnn_forward(params, x):
    # x: (N, 1, 28, 28) NCHW float32 (PyTorch convention)
    x = jnp.transpose(x, (0, 2, 3, 1))                                   # NHWC once
    x = conv3x3_relu_nhwc(x, params["conv1_w"], params["conv1_b"])       # (N,28,28,16)
    x = maxpool2x2_nhwc(x)                                               # (N,14,14,16)
    x = conv3x3_relu_nhwc(x, params["conv2_w"], params["conv2_b"])       # (N,14,14,32)
    x = maxpool2x2_nhwc(x)                                               # (N,7,7,32)
    x = x.reshape(x.shape[0], -1)                                        # (N,1568) NHWC order (fc1_w pre-permuted)
    return fc_head(x, params["fc1_w"], params["fc1_b"],
                   params["fc2_w"], params["fc2_b"])                     # (N,10)


if __name__ == "__main__":
    key = jax.random.PRNGKey(0)
    k_param, k_x = jax.random.split(key)
    params = prepare_params(init_params(k_param))
    # 28x28 spatial is required by fc1 (32*7*7 after two 2x2 pools).
    x = jax.random.normal(k_x, (2, 1, 28, 28), jnp.float32)
    out = jax.jit(simple_cnn_forward)(params, x)
    out = jax.block_until_ready(out)
    assert out.shape == (2, 10) and out.dtype == jnp.float32
    print("KERNEL_OK")
</pallas_src>

<mosaic_0001>
module attributes {stable_mosaic.version = 11 : i64} {
  func.func @kernel(%arg0: i32, %arg1: memref<1x30x30x1xf32, #tpu.memory_space<vmem>>, %arg2: memref<3x3x1x16xbf16, #tpu.memory_space<vmem>>, %arg3: memref<1x16xf32, #tpu.memory_space<vmem>>, %arg4: memref<1x28x28x16xf32, #tpu.memory_space<vmem>>) attributes {dimension_semantics = [#tpu.dimension_semantics<parallel>], iteration_bounds = array<i64: 2>, scalar_prefetch = 0 : i64, scratch_operands = 0 : i64, tpu.core_type = #tpu.core_type<tc>, window_params = [{transform_indices = @transform_0, window_bounds = array<i64: 1, 30, 30, 1>}, {pipeline_mode = #tpu.pipeline_mode<synchronous>, transform_indices = @transform_1, window_bounds = array<i64: 3, 3, 1, 16>}, {pipeline_mode = #tpu.pipeline_mode<synchronous>, transform_indices = @transform_2, window_bounds = array<i64: 1, 16>}, {transform_indices = @transform_3, window_bounds = array<i64: 1, 28, 28, 16>}]} {
    %c0 = arith.constant 0 : index
    %c0_0 = arith.constant 0 : index
    %0 = vector.load %arg3[%c0, %c0_0] : memref<1x16xf32, #tpu.memory_space<vmem>>, vector<1x16xf32>
    %c0_i32 = arith.constant 0 : i32
    %c28_i32 = arith.constant 28 : i32
    %1 = arith.addi %c0_i32, %c28_i32 : i32
    %c1_i32 = arith.constant 1 : i32
    scf.for %arg5 = %c0_i32 to %1 step %c1_i32  : i32 {
      %cst = arith.constant 0.000000e+00 : f32
      %2 = vector.broadcast %cst : f32 to vector<28x16xf32>
      %c0_i32_2 = arith.constant 0 : i32
      %3 = arith.addi %arg5, %c0_i32_2 : i32
      %c0_3 = arith.constant 0 : index
      %4 = arith.index_cast %3 : i32 to index
      %c0_4 = arith.constant 0 : index
      %c0_5 = arith.constant 0 : index
      %5 = vector.load %arg1[%c0_3, %4, %c0_4, %c0_5] : memref<1x30x30x1xf32, #tpu.memory_space<vmem>>, vector<1x1x28x1xf32>
      %6 = vector.shape_cast %5 : vector<1x1x28x1xf32> to vector<28x1xf32>
      %c0_6 = arith.constant 0 : index
      %c0_7 = arith.constant 0 : index
      %c0_8 = arith.constant 0 : index
      %c0_9 = arith.constant 0 : index
      %7 = vector.load %arg2[%c0_6, %c0_7, %c0_8, %c0_9] : memref<3x3x1x16xbf16, #tpu.memory_space<vmem>>, vector<1x1x1x16xbf16>
      %8 = vector.shape_cast %7 : vector<1x1x1x16xbf16> to vector<1x16xbf16>
      %9 = arith.extf %8 : vector<1x16xbf16> to vector<1x16xf32>
      %10 = vector.broadcast %6 : vector<28x1xf32> to vector<28x16xf32>
      %11 = vector.broadcast %9 : vector<1x16xf32> to vector<28x16xf32>
      %12 = arith.mulf %10, %11 : vector<28x16xf32>
      %13 = arith.addf %2, %12 : vector<28x16xf32>
      %c0_i32_10 = arith.constant 0 : i32
      %14 = arith.addi %arg5, %c0_i32_10 : i32
      %c0_11 = arith.constant 0 : index
      %15 = arith.index_cast %14 : i32 to index
      %c1 = arith.constant 1 : index
      %c0_12 = arith.constant 0 : index
      %16 = vector.load %arg1[%c0_11, %15, %c1, %c0_12] : memref<1x30x30x1xf32, #tpu.memory_space<vmem>>, vector<1x1x28x1xf32>
      %17 = vector.shape_cast %16 : vector<1x1x28x1xf32> to vector<28x1xf32>
      %c0_13 = arith.constant 0 : index
      %c1_14 = arith.constant 1 : index
      %c0_15 = arith.constant 0 : index
      %c0_16 = arith.constant 0 : index
      %18 = vector.load %arg2[%c0_13, %c1_14, %c0_15, %c0_16] : memref<3x3x1x16xbf16, #tpu.memory_space<vmem>>, vector<1x1x1x16xbf16>
      %19 = vector.shape_cast %18 : vector<1x1x1x16xbf16> to vector<1x16xbf16>
      %20 = arith.extf %19 : vector<1x16xbf16> to vector<1x16xf32>
      %21 = vector.broadcast %17 : vector<28x1xf32> to vector<28x16xf32>
      %22 = vector.broadcast %20 : vector<1x16xf32> to vector<28x16xf32>
      %23 = arith.mulf %21, %22 : vector<28x16xf32>
      %24 = arith.addf %13, %23 : vector<28x16xf32>
      %c0_i32_17 = arith.constant 0 : i32
      %25 = arith.addi %arg5, %c0_i32_17 : i32
      %c0_18 = arith.constant 0 : index
      %26 = arith.index_cast %25 : i32 to index
      %c2 = arith.constant 2 : index
      %c0_19 = arith.constant 0 : index
      %27 = vector.load %arg1[%c0_18, %26, %c2, %c0_19] : memref<1x30x30x1xf32, #tpu.memory_space<vmem>>, vector<1x1x28x1xf32>
      %28 = vector.shape_cast %27 : vector<1x1x28x1xf32> to vector<28x1xf32>
      %c0_20 = arith.constant 0 : index
      %c2_21 = arith.constant 2 : index
      %c0_22 = arith.constant 0 : index
      %c0_23 = arith.constant 0 : index
      %29 = vector.load %arg2[%c0_20, %c2_21, %c0_22, %c0_23] : memref<3x3x1x16xbf16, #tpu.memory_space<vmem>>, vector<1x1x1x16xbf16>
      %30 = vector.shape_cast %29 : vector<1x1x1x16xbf16> to vector<1x16xbf16>
      %31 = arith.extf %30 : vector<1x16xbf16> to vector<1x16xf32>
      %32 = vector.broadcast %28 : vector<28x1xf32> to vector<28x16xf32>
      %33 = vector.broadcast %31 : vector<1x16xf32> to vector<28x16xf32>
      %34 = arith.mulf %32, %33 : vector<28x16xf32>
      %35 = arith.addf %24, %34 : vector<28x16xf32>
      %c1_i32_24 = arith.constant 1 : i32
      %36 = arith.addi %arg5, %c1_i32_24 : i32
      %c0_25 = arith.constant 0 : index
      %37 = arith.index_cast %36 : i32 to index
      %c0_26 = arith.constant 0 : index
      %c0_27 = arith.constant 0 : index
      %38 = vector.load %arg1[%c0_25, %37, %c0_26, %c0_27] : memref<1x30x30x1xf32, #tpu.memory_space<vmem>>, vector<1x1x28x1xf32>
      %39 = vector.shape_cast %38 : vector<1x1x28x1xf32> to vector<28x1xf32>
      %c1_28 = arith.constant 1 : index
      %c0_29 = arith.constant 0 : index
      %c0_30 = arith.constant 0 : index
      %c0_31 = arith.constant 0 : index
      %40 = vector.load %arg2[%c1_28, %c0_29, %c0_30, %c0_31] : memref<3x3x1x16xbf16, #tpu.memory_space<vmem>>, vector<1x1x1x16xbf16>
      %41 = vector.shape_cast %40 : vector<1x1x1x16xbf16> to vector<1x16xbf16>
      %42 = arith.extf %41 : vector<1x16xbf16> to vector<1x16xf32>
      %43 = vector.broadcast %39 : vector<28x1xf32> to vector<28x16xf32>
      %44 = vector.broadcast %42 : vector<1x16xf32> to vector<28x16xf32>
      %45 = arith.mulf %43, %44 : vector<28x16xf32>
      %46 = arith.addf %35, %45 : vector<28x16xf32>
      %c1_i32_32 = arith.constant 1 : i32
      %47 = arith.addi %arg5, %c1_i32_32 : i32
      %c0_33 = arith.constant 0 : index
      %48 = arith.index_cast %47 : i32 to index
      %c1_34 = arith.constant 1 : index
      %c0_35 = arith.constant 0 : index
      %49 = vector.load %arg1[%c0_33, %48, %c1_34, %c0_35] : memref<1x30x30x1xf32, #tpu.memory_space<vmem>>, vector<1x1x28x1xf32>
      %50 = vector.shape_cast %49 : vector<1x1x28x1xf32> to vector<28x1xf32>
      %c1_36 = arith.constant 1 : index
      %c1_37 = arith.constant 1 : index
      %c0_38 = arith.constant 0 : index
      %c0_39 = arith.constant 0 : index
      %51 = vector.load %arg2[%c1_36, %c1_37, %c0_38, %c0_39] : memref<3x3x1x16xbf16, #tpu.memory_space<vmem>>, vector<1x1x1x16xbf16>
      %52 = vector.shape_cast %51 : vector<1x1x1x16xbf16> to vector<1x16xbf16>
      %53 = arith.extf %52 : vector<1x16xbf16> to vector<1x16xf32>
      %54 = vector.broadcast %50 : vector<28x1xf32> to vector<28x16xf32>
      %55 = vector.broadcast %53 : vector<1x16xf32> to vector<28x16xf32>
      %56 = arith.mulf %54, %55 : vector<28x16xf32>
      %57 = arith.addf %46, %56 : vector<28x16xf32>
      %c1_i32_40 = arith.constant 1 : i32
      %58 = arith.addi %arg5, %c1_i32_40 : i32
      %c0_41 = arith.constant 0 : index
      %59 = arith.index_cast %58 : i32 to index
      %c2_42 = arith.constant 2 : index
      %c0_43 = arith.constant 0 : index
      %60 = vector.load %arg1[%c0_41, %59, %c2_42, %c0_43] : memref<1x30x30x1xf32, #tpu.memory_space<vmem>>, vector<1x1x28x1xf32>
      %61 = vector.shape_cast %60 : vector<1x1x28x1xf32> to vector<28x1xf32>
      %c1_44 = arith.constant 1 : index
      %c2_45 = arith.constant 2 : index
      %c0_46 = arith.constant 0 : index
      %c0_47 = arith.constant 0 : index
      %62 = vector.load %arg2[%c1_44, %c2_45, %c0_46, %c0_47] : memref<3x3x1x16xbf16, #tpu.memory_space<vmem>>, vector<1x1x1x16xbf16>
      %63 = vector.shape_cast %62 : vector<1x1x1x16xbf16> to vector<1x16xbf16>
      %64 = arith.extf %63 : vector<1x16xbf16> to vector<1x16xf32>
      %65 = vector.broadcast %61 : vector<28x1xf32> to vector<28x16xf32>
      %66 = vector.broadcast %64 : vector<1x16xf32> to vector<28x16xf32>
      %67 = arith.mulf %65, %66 : vector<28x16xf32>
      %68 = arith.addf %57, %67 : vector<28x16xf32>
      %c2_i32 = arith.constant 2 : i32
      %69 = arith.addi %arg5, %c2_i32 : i32
      %c0_48 = arith.constant 0 : index
      %70 = arith.index_cast %69 : i32 to index
      %c0_49 = arith.constant 0 : index
      %c0_50 = arith.constant 0 : index
      %71 = vector.load %arg1[%c0_48, %70, %c0_49, %c0_50] : memref<1x30x30x1xf32, #tpu.memory_space<vmem>>, vector<1x1x28x1xf32>
      %72 = vector.shape_cast %71 : vector<1x1x28x1xf32> to vector<28x1xf32>
      %c2_51 = arith.constant 2 : index
      %c0_52 = arith.constant 0 : index
      %c0_53 = arith.constant 0 : index
      %c0_54 = arith.constant 0 : index
      %73 = vector.load %arg2[%c2_51, %c0_52, %c0_53, %c0_54] : memref<3x3x1x16xbf16, #tpu.memory_space<vmem>>, vector<1x1x1x16xbf16>
      %74 = vector.shape_cast %73 : vector<1x1x1x16xbf16> to vector<1x16xbf16>
      %75 = arith.extf %74 : vector<1x16xbf16> to vector<1x16xf32>
      %76 = vector.broadcast %72 : vector<28x1xf32> to vector<28x16xf32>
      %77 = vector.broadcast %75 : vector<1x16xf32> to vector<28x16xf32>
      %78 = arith.mulf %76, %77 : vector<28x16xf32>
      %79 = arith.addf %68, %78 : vector<28x16xf32>
      %c2_i32_55 = arith.constant 2 : i32
      %80 = arith.addi %arg5, %c2_i32_55 : i32
      %c0_56 = arith.constant 0 : index
      %81 = arith.index_cast %80 : i32 to index
      %c1_57 = arith.constant 1 : index
      %c0_58 = arith.constant 0 : index
      %82 = vector.load %arg1[%c0_56, %81, %c1_57, %c0_58] : memref<1x30x30x1xf32, #tpu.memory_space<vmem>>, vector<1x1x28x1xf32>
      %83 = vector.shape_cast %82 : vector<1x1x28x1xf32> to vector<28x1xf32>
      %c2_59 = arith.constant 2 : index
      %c1_60 = arith.constant 1 : index
      %c0_61 = arith.constant 0 : index
      %c0_62 = arith.constant 0 : index
      %84 = vector.load %arg2[%c2_59, %c1_60, %c0_61, %c0_62] : memref<3x3x1x16xbf16, #tpu.memory_space<vmem>>, vector<1x1x1x16xbf16>
      %85 = vector.shape_cast %84 : vector<1x1x1x16xbf16> to vector<1x16xbf16>
      %86 = arith.extf %85 : vector<1x16xbf16> to vector<1x16xf32>
      %87 = vector.broadcast %83 : vector<28x1xf32> to vector<28x16xf32>
      %88 = vector.broadcast %86 : vector<1x16xf32> to vector<28x16xf32>
      %89 = arith.mulf %87, %88 : vector<28x16xf32>
      %90 = arith.addf %79, %89 : vector<28x16xf32>
      %c2_i32_63 = arith.constant 2 : i32
      %91 = arith.addi %arg5, %c2_i32_63 : i32
      %c0_64 = arith.constant 0 : index
      %92 = arith.index_cast %91 : i32 to index
      %c2_65 = arith.constant 2 : index
      %c0_66 = arith.constant 0 : index
      %93 = vector.load %arg1[%c0_64, %92, %c2_65, %c0_66] : memref<1x30x30x1xf32, #tpu.memory_space<vmem>>, vector<1x1x28x1xf32>
      %94 = vector.shape_cast %93 : vector<1x1x28x1xf32> to vector<28x1xf32>
      %c2_67 = arith.constant 2 : index
      %c2_68 = arith.constant 2 : index
      %c0_69 = arith.constant 0 : index
      %c0_70 = arith.constant 0 : index
      %95 = vector.load %arg2[%c2_67, %c2_68, %c0_69, %c0_70] : memref<3x3x1x16xbf16, #tpu.memory_space<vmem>>, vector<1x1x1x16xbf16>
      %96 = vector.shape_cast %95 : vector<1x1x1x16xbf16> to vector<1x16xbf16>
      %97 = arith.extf %96 : vector<1x16xbf16> to vector<1x16xf32>
      %98 = vector.broadcast %94 : vector<28x1xf32> to vector<28x16xf32>
      %99 = vector.broadcast %97 : vector<1x16xf32> to vector<28x16xf32>
      %100 = arith.mulf %98, %99 : vector<28x16xf32>
      %101 = arith.addf %90, %100 : vector<28x16xf32>
      %102 = vector.broadcast %0 : vector<1x16xf32> to vector<28x16xf32>
      %103 = arith.addf %101, %102 : vector<28x16xf32>
      %cst_71 = arith.constant 0.000000e+00 : f32
      %104 = vector.broadcast %cst_71 : f32 to vector<28x16xf32>
      %105 = arith.maximumf %103, %104 : vector<28x16xf32>
      %c0_72 = arith.constant 0 : index
      %106 = arith.index_cast %arg5 : i32 to index
      %c0_73 = arith.constant 0 : index
      %c0_74 = arith.constant 0 : index
      %107 = vector.load %arg4[%c0_72, %106, %c0_73, %c0_74] : memref<1x28x28x16xf32, #tpu.memory_space<vmem>>, vector<1x1x28x16xf32>
      %108 = vector.shape_cast %107 : vector<1x1x28x16xf32> to vector<28x16xf32>
      %109 = vector.shape_cast %105 : vector<28x16xf32> to vector<1x1x28x16xf32>
      tpu.vector_store %arg4[%c0_72, %106, %c0_73, %c0_74], %109 {strides = array<i32>} : memref<1x28x28x16xf32, #tpu.memory_space<vmem>>, vector<1x1x28x16xf32>,
    }
    %c28_i32_1 = arith.constant 28 : i32
    return
  }
  func.func @transform_0(%arg0: i32) -> (i32, i32, i32, i32) {
    %c0_i32 = arith.constant 0 : i32
    %c0_i32_0 = arith.constant 0 : i32
    %c0_i32_1 = arith.constant 0 : i32
    %c0_i32_2 = arith.constant 0 : i32
    return %arg0, %c0_i32, %c0_i32_0, %c0_i32_1 : i32, i32, i32, i32
  }
  func.func @transform_1(%arg0: i32) -> (i32, i32, i32, i32) {
    %c0_i32 = arith.constant 0 : i32
    %c0_i32_0 = arith.constant 0 : i32
    %c0_i32_1 = arith.constant 0 : i32
    %c0_i32_2 = arith.constant 0 : i32
    %c0_i32_3 = arith.constant 0 : i32
    return %c0_i32, %c0_i32_0, %c0_i32_1, %c0_i32_2 : i32, i32, i32, i32
  }
  func.func @transform_2(%arg0: i32) -> (i32, i32) {
    %c0_i32 = arith.constant 0 : i32
    %c0_i32_0 = arith.constant 0 : i32
    %c0_i32_1 = arith.constant 0 : i32
    return %c0_i32, %c0_i32_0 : i32, i32
  }
  func.func @transform_3(%arg0: i32) -> (i32, i32, i32, i32) {
    %c0_i32 = arith.constant 0 : i32
    %c0_i32_0 = arith.constant 0 : i32
    %c0_i32_1 = arith.constant 0 : i32
    %c0_i32_2 = arith.constant 0 : i32
    return %arg0, %c0_i32, %c0_i32_0, %c0_i32_1 : i32, i32, i32, i32
  }
}

module attributes {stable_mosaic.version = 11 : i64} {
  func.func @kernel(%arg0: i32, %arg1: memref<32x2x14x32xf32, #tpu.memory_space<vmem>>, %arg2: memref<32x14x16xf32, #tpu.memory_space<vmem>>) attributes {dimension_semantics = [#tpu.dimension_semantics<parallel>], iteration_bounds = array<i64: 1>, scalar_prefetch = 0 : i64, scratch_operands = 0 : i64, tpu.core_type = #tpu.core_type<tc>, window_params = [{transform_indices = @transform_0, window_bounds = array<i64: 32, 2, 14, 32>}, {transform_indices = @transform_1, window_bounds = array<i64: 32, 14, 16>}]} {
    %c0 = arith.constant 0 : index
    %c0_0 = arith.constant 0 : index
    %c0_1 = arith.constant 0 : index
    %c0_2 = arith.constant 0 : index
    %0 = vector.load %arg1[%c0, %c0_0, %c0_1, %c0_2] : memref<32x2x14x32xf32, #tpu.memory_space<vmem>>, vector<32x2x14x32xf32>
    %1 = vector.extract_strided_slice %0 {offsets = [0, 0, 0, 0], sizes = [32, 1, 14, 32], strides = [1, 1, 1, 1]} : vector<32x2x14x32xf32> to vector<32x1x14x32xf32>
    %2 = vector.shape_cast %1 : vector<32x1x14x32xf32> to vector<32x14x32xf32>
    %3 = vector.extract_strided_slice %0 {offsets = [0, 1, 0, 0], sizes = [32, 1, 14, 32], strides = [1, 1, 1, 1]} : vector<32x2x14x32xf32> to vector<32x1x14x32xf32>
    %4 = vector.shape_cast %3 : vector<32x1x14x32xf32> to vector<32x14x32xf32>
    %5 = arith.maximumf %2, %4 : vector<32x14x32xf32>
    %6 = vector.extract_strided_slice %5 {offsets = [0, 0, 0], sizes = [32, 14, 16], strides = [1, 1, 1]} : vector<32x14x32xf32> to vector<32x14x16xf32>
    %7 = vector.extract_strided_slice %5 {offsets = [0, 0, 16], sizes = [32, 14, 16], strides = [1, 1, 1]} : vector<32x14x32xf32> to vector<32x14x16xf32>
    %8 = arith.maximumf %6, %7 : vector<32x14x16xf32>
    %c0_3 = arith.constant 0 : index
    %c0_4 = arith.constant 0 : index
    %c0_5 = arith.constant 0 : index
    %9 = vector.load %arg2[%c0_3, %c0_4, %c0_5] : memref<32x14x16xf32, #tpu.memory_space<vmem>>, vector<32x14x16xf32>
    tpu.vector_store %arg2[%c0_3, %c0_4, %c0_5], %8 {strides = array<i32>} : memref<32x14x16xf32, #tpu.memory_space<vmem>>, vector<32x14x16xf32>,
    return
  }
  func.func @transform_0(%arg0: i32) -> (i32, i32, i32, i32) {
    %c0_i32 = arith.constant 0 : i32
    %c0_i32_0 = arith.constant 0 : i32
    %c0_i32_1 = arith.constant 0 : i32
    %c0_i32_2 = arith.constant 0 : i32
    return %arg0, %c0_i32, %c0_i32_0, %c0_i32_1 : i32, i32, i32, i32
  }
  func.func @transform_1(%arg0: i32) -> (i32, i32, i32) {
    %c0_i32 = arith.constant 0 : i32
    %c0_i32_0 = arith.constant 0 : i32
    %c0_i32_1 = arith.constant 0 : i32
    return %arg0, %c0_i32, %c0_i32_0 : i32, i32, i32
  }
}

module attributes {stable_mosaic.version = 11 : i64} {
  func.func @kernel(%arg0: i32, %arg1: memref<1x16x16x16xf32, #tpu.memory_space<vmem>>, %arg2: memref<3x3x16x32xbf16, #tpu.memory_space<vmem>>, %arg3: memref<1x32xf32, #tpu.memory_space<vmem>>, %arg4: memref<1x14x14x32xf32, #tpu.memory_space<vmem>>) attributes {dimension_semantics = [#tpu.dimension_semantics<parallel>], iteration_bounds = array<i64: 2>, scalar_prefetch = 0 : i64, scratch_operands = 0 : i64, tpu.core_type = #tpu.core_type<tc>, window_params = [{transform_indices = @transform_0, window_bounds = array<i64: 1, 16, 16, 16>}, {pipeline_mode = #tpu.pipeline_mode<synchronous>, transform_indices = @transform_1, window_bounds = array<i64: 3, 3, 16, 32>}, {pipeline_mode = #tpu.pipeline_mode<synchronous>, transform_indices = @transform_2, window_bounds = array<i64: 1, 32>}, {transform_indices = @transform_3, window_bounds = array<i64: 1, 14, 14, 32>}]} {
    %c0 = arith.constant 0 : index
    %c0_0 = arith.constant 0 : index
    %0 = vector.load %arg3[%c0, %c0_0] : memref<1x32xf32, #tpu.memory_space<vmem>>, vector<1x32xf32>
    %c0_i32 = arith.constant 0 : i32
    %c14_i32 = arith.constant 14 : i32
    %1 = arith.addi %c0_i32, %c14_i32 : i32
    %c1_i32 = arith.constant 1 : i32
    scf.for %arg5 = %c0_i32 to %1 step %c1_i32  : i32 {
      %cst = arith.constant 0.000000e+00 : f32
      %2 = vector.broadcast %cst : f32 to vector<14x32xf32>
      %c0_i32_2 = arith.constant 0 : i32
      %3 = arith.addi %arg5, %c0_i32_2 : i32
      %c0_3 = arith.constant 0 : index
      %4 = arith.index_cast %3 : i32 to index
      %c0_4 = arith.constant 0 : index
      %c0_5 = arith.constant 0 : index
      %5 = vector.load %arg1[%c0_3, %4, %c0_4, %c0_5] : memref<1x16x16x16xf32, #tpu.memory_space<vmem>>, vector<1x1x14x16xf32>
      %6 = vector.shape_cast %5 : vector<1x1x14x16xf32> to vector<14x16xf32>
      %c0_6 = arith.constant 0 : index
      %c0_7 = arith.constant 0 : index
      %c0_8 = arith.constant 0 : index
      %c0_9 = arith.constant 0 : index
      %7 = vector.load %arg2[%c0_6, %c0_7, %c0_8, %c0_9] : memref<3x3x16x32xbf16, #tpu.memory_space<vmem>>, vector<1x1x16x32xbf16>
      %8 = vector.shape_cast %7 : vector<1x1x16x32xbf16> to vector<16x32xbf16>
      %9 = arith.truncf %6 : vector<14x16xf32> to vector<14x16xbf16>
      %cst_10 = arith.constant dense<0.000000e+00> : vector<14x32xf32>
      %10 = tpu.matmul %9, %8, %cst_10 {dimension_numbers = #tpu.dot_dimension_numbers<[1], [0], [0], [1], [0, 0, 1, 1], [], []>} : vector<14x16xbf16>, vector<16x32xbf16>, vector<14x32xf32> -> vector<14x32xf32>
      %11 = arith.addf %2, %10 : vector<14x32xf32>
      %c0_i32_11 = arith.constant 0 : i32
      %12 = arith.addi %arg5, %c0_i32_11 : i32
      %c0_12 = arith.constant 0 : index
      %13 = arith.index_cast %12 : i32 to index
      %c1 = arith.constant 1 : index
      %c0_13 = arith.constant 0 : index
      %14 = vector.load %arg1[%c0_12, %13, %c1, %c0_13] : memref<1x16x16x16xf32, #tpu.memory_space<vmem>>, vector<1x1x14x16xf32>
      %15 = vector.shape_cast %14 : vector<1x1x14x16xf32> to vector<14x16xf32>
      %c0_14 = arith.constant 0 : index
      %c1_15 = arith.constant 1 : index
      %c0_16 = arith.constant 0 : index
      %c0_17 = arith.constant 0 : index
      %16 = vector.load %arg2[%c0_14, %c1_15, %c0_16, %c0_17] : memref<3x3x16x32xbf16, #tpu.memory_space<vmem>>, vector<1x1x16x32xbf16>
      %17 = vector.shape_cast %16 : vector<1x1x16x32xbf16> to vector<16x32xbf16>
      %18 = arith.truncf %15 : vector<14x16xf32> to vector<14x16xbf16>
      %cst_18 = arith.constant dense<0.000000e+00> : vector<14x32xf32>
      %19 = tpu.matmul %18, %17, %cst_18 {dimension_numbers = #tpu.dot_dimension_numbers<[1], [0], [0], [1], [0, 0, 1, 1], [], []>} : vector<14x16xbf16>, vector<16x32xbf16>, vector<14x32xf32> -> vector<14x32xf32>
      %20 = arith.addf %11, %19 : vector<14x32xf32>
      %c0_i32_19 = arith.constant 0 : i32
      %21 = arith.addi %arg5, %c0_i32_19 : i32
      %c0_20 = arith.constant 0 : index
      %22 = arith.index_cast %21 : i32 to index
      %c2 = arith.constant 2 : index
      %c0_21 = arith.constant 0 : index
      %23 = vector.load %arg1[%c0_20, %22, %c2, %c0_21] : memref<1x16x16x16xf32, #tpu.memory_space<vmem>>, vector<1x1x14x16xf32>
      %24 = vector.shape_cast %23 : vector<1x1x14x16xf32> to vector<14x16xf32>
      %c0_22 = arith.constant 0 : index
      %c2_23 = arith.constant 2 : index
      %c0_24 = arith.constant 0 : index
      %c0_25 = arith.constant 0 : index
      %25 = vector.load %arg2[%c0_22, %c2_23, %c0_24, %c0_25] : memref<3x3x16x32xbf16, #tpu.memory_space<vmem>>, vector<1x1x16x32xbf16>
      %26 = vector.shape_cast %25 : vector<1x1x16x32xbf16> to vector<16x32xbf16>
      %27 = arith.truncf %24 : vector<14x16xf32> to vector<14x16xbf16>
      %cst_26 = arith.constant dense<0.000000e+00> : vector<14x32xf32>
      %28 = tpu.matmul %27, %26, %cst_26 {dimension_numbers = #tpu.dot_dimension_numbers<[1], [0], [0], [1], [0, 0, 1, 1], [], []>} : vector<14x16xbf16>, vector<16x32xbf16>, vector<14x32xf32> -> vector<14x32xf32>
      %29 = arith.addf %20, %28 : vector<14x32xf32>
      %c1_i32_27 = arith.constant 1 : i32
      %30 = arith.addi %arg5, %c1_i32_27 : i32
      %c0_28 = arith.constant 0 : index
      %31 = arith.index_cast %30 : i32 to index
      %c0_29 = arith.constant 0 : index
      %c0_30 = arith.constant 0 : index
      %32 = vector.load %arg1[%c0_28, %31, %c0_29, %c0_30] : memref<1x16x16x16xf32, #tpu.memory_space<vmem>>, vector<1x1x14x16xf32>
      %33 = vector.shape_cast %32 : vector<1x1x14x16xf32> to vector<14x16xf32>
      %c1_31 = arith.constant 1 : index
      %c0_32 = arith.constant 0 : index
      %c0_33 = arith.constant 0 : index
      %c0_34 = arith.constant 0 : index
      %34 = vector.load %arg2[%c1_31, %c0_32, %c0_33, %c0_34] : memref<3x3x16x32xbf16, #tpu.memory_space<vmem>>, vector<1x1x16x32xbf16>
      %35 = vector.shape_cast %34 : vector<1x1x16x32xbf16> to vector<16x32xbf16>
      %36 = arith.truncf %33 : vector<14x16xf32> to vector<14x16xbf16>
      %cst_35 = arith.constant dense<0.000000e+00> : vector<14x32xf32>
      %37 = tpu.matmul %36, %35, %cst_35 {dimension_numbers = #tpu.dot_dimension_numbers<[1], [0], [0], [1], [0, 0, 1, 1], [], []>} : vector<14x16xbf16>, vector<16x32xbf16>, vector<14x32xf32> -> vector<14x32xf32>
      %38 = arith.addf %29, %37 : vector<14x32xf32>
      %c1_i32_36 = arith.constant 1 : i32
      %39 = arith.addi %arg5, %c1_i32_36 : i32
      %c0_37 = arith.constant 0 : index
      %40 = arith.index_cast %39 : i32 to index
      %c1_38 = arith.constant 1 : index
      %c0_39 = arith.constant 0 : index
      %41 = vector.load %arg1[%c0_37, %40, %c1_38, %c0_39] : memref<1x16x16x16xf32, #tpu.memory_space<vmem>>, vector<1x1x14x16xf32>
      %42 = vector.shape_cast %41 : vector<1x1x14x16xf32> to vector<14x16xf32>
      %c1_40 = arith.constant 1 : index
      %c1_41 = arith.constant 1 : index
      %c0_42 = arith.constant 0 : index
      %c0_43 = arith.constant 0 : index
      %43 = vector.load %arg2[%c1_40, %c1_41, %c0_42, %c0_43] : memref<3x3x16x32xbf16, #tpu.memory_space<vmem>>, vector<1x1x16x32xbf16>
      %44 = vector.shape_cast %43 : vector<1x1x16x32xbf16> to vector<16x32xbf16>
      %45 = arith.truncf %42 : vector<14x16xf32> to vector<14x16xbf16>
      %cst_44 = arith.constant dense<0.000000e+00> : vector<14x32xf32>
      %46 = tpu.matmul %45, %44, %cst_44 {dimension_numbers = #tpu.dot_dimension_numbers<[1], [0], [0], [1], [0, 0, 1, 1], [], []>} : vector<14x16xbf16>, vector<16x32xbf16>, vector<14x32xf32> -> vector<14x32xf32>
      %47 = arith.addf %38, %46 : vector<14x32xf32>
      %c1_i32_45 = arith.constant 1 : i32
      %48 = arith.addi %arg5, %c1_i32_45 : i32
      %c0_46 = arith.constant 0 : index
      %49 = arith.index_cast %48 : i32 to index
      %c2_47 = arith.constant 2 : index
      %c0_48 = arith.constant 0 : index
      %50 = vector.load %arg1[%c0_46, %49, %c2_47, %c0_48] : memref<1x16x16x16xf32, #tpu.memory_space<vmem>>, vector<1x1x14x16xf32>
      %51 = vector.shape_cast %50 : vector<1x1x14x16xf32> to vector<14x16xf32>
      %c1_49 = arith.constant 1 : index
      %c2_50 = arith.constant 2 : index
      %c0_51 = arith.constant 0 : index
      %c0_52 = arith.constant 0 : index
      %52 = vector.load %arg2[%c1_49, %c2_50, %c0_51, %c0_52] : memref<3x3x16x32xbf16, #tpu.memory_space<vmem>>, vector<1x1x16x32xbf16>
      %53 = vector.shape_cast %52 : vector<1x1x16x32xbf16> to vector<16x32xbf16>
      %54 = arith.truncf %51 : vector<14x16xf32> to vector<14x16xbf16>
      %cst_53 = arith.constant dense<0.000000e+00> : vector<14x32xf32>
      %55 = tpu.matmul %54, %53, %cst_53 {dimension_numbers = #tpu.dot_dimension_numbers<[1], [0], [0], [1], [0, 0, 1, 1], [], []>} : vector<14x16xbf16>, vector<16x32xbf16>, vector<14x32xf32> -> vector<14x32xf32>
      %56 = arith.addf %47, %55 : vector<14x32xf32>
      %c2_i32 = arith.constant 2 : i32
      %57 = arith.addi %arg5, %c2_i32 : i32
      %c0_54 = arith.constant 0 : index
      %58 = arith.index_cast %57 : i32 to index
      %c0_55 = arith.constant 0 : index
      %c0_56 = arith.constant 0 : index
      %59 = vector.load %arg1[%c0_54, %58, %c0_55, %c0_56] : memref<1x16x16x16xf32, #tpu.memory_space<vmem>>, vector<1x1x14x16xf32>
      %60 = vector.shape_cast %59 : vector<1x1x14x16xf32> to vector<14x16xf32>
      %c2_57 = arith.constant 2 : index
      %c0_58 = arith.constant 0 : index
      %c0_59 = arith.constant 0 : index
      %c0_60 = arith.constant 0 : index
      %61 = vector.load %arg2[%c2_57, %c0_58, %c0_59, %c0_60] : memref<3x3x16x32xbf16, #tpu.memory_space<vmem>>, vector<1x1x16x32xbf16>
      %62 = vector.shape_cast %61 : vector<1x1x16x32xbf16> to vector<16x32xbf16>
      %63 = arith.truncf %60 : vector<14x16xf32> to vector<14x16xbf16>
      %cst_61 = arith.constant dense<0.000000e+00> : vector<14x32xf32>
      %64 = tpu.matmul %63, %62, %cst_61 {dimension_numbers = #tpu.dot_dimension_numbers<[1], [0], [0], [1], [0, 0, 1, 1], [], []>} : vector<14x16xbf16>, vector<16x32xbf16>, vector<14x32xf32> -> vector<14x32xf32>
      %65 = arith.addf %56, %64 : vector<14x32xf32>
      %c2_i32_62 = arith.constant 2 : i32
      %66 = arith.addi %arg5, %c2_i32_62 : i32
      %c0_63 = arith.constant 0 : index
      %67 = arith.index_cast %66 : i32 to index
      %c1_64 = arith.constant 1 : index
      %c0_65 = arith.constant 0 : index
      %68 = vector.load %arg1[%c0_63, %67, %c1_64, %c0_65] : memref<1x16x16x16xf32, #tpu.memory_space<vmem>>, vector<1x1x14x16xf32>
      %69 = vector.shape_cast %68 : vector<1x1x14x16xf32> to vector<14x16xf32>
      %c2_66 = arith.constant 2 : index
      %c1_67 = arith.constant 1 : index
      %c0_68 = arith.constant 0 : index
      %c0_69 = arith.constant 0 : index
      %70 = vector.load %arg2[%c2_66, %c1_67, %c0_68, %c0_69] : memref<3x3x16x32xbf16, #tpu.memory_space<vmem>>, vector<1x1x16x32xbf16>
      %71 = vector.shape_cast %70 : vector<1x1x16x32xbf16> to vector<16x32xbf16>
      %72 = arith.truncf %69 : vector<14x16xf32> to vector<14x16xbf16>
      %cst_70 = arith.constant dense<0.000000e+00> : vector<14x32xf32>
      %73 = tpu.matmul %72, %71, %cst_70 {dimension_numbers = #tpu.dot_dimension_numbers<[1], [0], [0], [1], [0, 0, 1, 1], [], []>} : vector<14x16xbf16>, vector<16x32xbf16>, vector<14x32xf32> -> vector<14x32xf32>
      %74 = arith.addf %65, %73 : vector<14x32xf32>
      %c2_i32_71 = arith.constant 2 : i32
      %75 = arith.addi %arg5, %c2_i32_71 : i32
      %c0_72 = arith.constant 0 : index
      %76 = arith.index_cast %75 : i32 to index
      %c2_73 = arith.constant 2 : index
      %c0_74 = arith.constant 0 : index
      %77 = vector.load %arg1[%c0_72, %76, %c2_73, %c0_74] : memref<1x16x16x16xf32, #tpu.memory_space<vmem>>, vector<1x1x14x16xf32>
      %78 = vector.shape_cast %77 : vector<1x1x14x16xf32> to vector<14x16xf32>
      %c2_75 = arith.constant 2 : index
      %c2_76 = arith.constant 2 : index
      %c0_77 = arith.constant 0 : index
      %c0_78 = arith.constant 0 : index
      %79 = vector.load %arg2[%c2_75, %c2_76, %c0_77, %c0_78] : memref<3x3x16x32xbf16, #tpu.memory_space<vmem>>, vector<1x1x16x32xbf16>
      %80 = vector.shape_cast %79 : vector<1x1x16x32xbf16> to vector<16x32xbf16>
      %81 = arith.truncf %78 : vector<14x16xf32> to vector<14x16xbf16>
      %cst_79 = arith.constant dense<0.000000e+00> : vector<14x32xf32>
      %82 = tpu.matmul %81, %80, %cst_79 {dimension_numbers = #tpu.dot_dimension_numbers<[1], [0], [0], [1], [0, 0, 1, 1], [], []>} : vector<14x16xbf16>, vector<16x32xbf16>, vector<14x32xf32> -> vector<14x32xf32>
      %83 = arith.addf %74, %82 : vector<14x32xf32>
      %84 = vector.broadcast %0 : vector<1x32xf32> to vector<14x32xf32>
      %85 = arith.addf %83, %84 : vector<14x32xf32>
      %cst_80 = arith.constant 0.000000e+00 : f32
      %86 = vector.broadcast %cst_80 : f32 to vector<14x32xf32>
      %87 = arith.maximumf %85, %86 : vector<14x32xf32>
      %c0_81 = arith.constant 0 : index
      %88 = arith.index_cast %arg5 : i32 to index
      %c0_82 = arith.constant 0 : index
      %c0_83 = arith.constant 0 : index
      %89 = vector.load %arg4[%c0_81, %88, %c0_82, %c0_83] : memref<1x14x14x32xf32, #tpu.memory_space<vmem>>, vector<1x1x14x32xf32>
      %90 = vector.shape_cast %89 : vector<1x1x14x32xf32> to vector<14x32xf32>
      %91 = vector.shape_cast %87 : vector<14x32xf32> to vector<1x1x14x32xf32>
      tpu.vector_store %arg4[%c0_81, %88, %c0_82, %c0_83], %91 {strides = array<i32>} : memref<1x14x14x32xf32, #tpu.memory_space<vmem>>, vector<1x1x14x32xf32>,
    }
    %c14_i32_1 = arith.constant 14 : i32
    return
  }
  func.func @transform_0(%arg0: i32) -> (i32, i32, i32, i32) {
    %c0_i32 = arith.constant 0 : i32
    %c0_i32_0 = arith.constant 0 : i32
    %c0_i32_1 = arith.constant 0 : i32
    %c0_i32_2 = arith.constant 0 : i32
    return %arg0, %c0_i32, %c0_i32_0, %c0_i32_1 : i32, i32, i32, i32
  }
  func.func @transform_1(%arg0: i32) -> (i32, i32, i32, i32) {
    %c0_i32 = arith.constant 0 : i32
    %c0_i32_0 = arith.constant 0 : i32
    %c0_i32_1 = arith.constant 0 : i32
    %c0_i32_2 = arith.constant 0 : i32
    %c0_i32_3 = arith.constant 0 : i32
    return %c0_i32, %c0_i32_0, %c0_i32_1, %c0_i32_2 : i32, i32, i32, i32
  }
  func.func @transform_2(%arg0: i32) -> (i32, i32) {
    %c0_i32 = arith.constant 0 : i32
    %c0_i32_0 = arith.constant 0 : i32
    %c0_i32_1 = arith.constant 0 : i32
    return %c0_i32, %c0_i32_0 : i32, i32
  }
  func.func @transform_3(%arg0: i32) -> (i32, i32, i32, i32) {
    %c0_i32 = arith.constant 0 : i32
    %c0_i32_0 = arith.constant 0 : i32
    %c0_i32_1 = arith.constant 0 : i32
    %c0_i32_2 = arith.constant 0 : i32
    return %arg0, %c0_i32, %c0_i32_0, %c0_i32_1 : i32, i32, i32, i32
  }
}

module attributes {stable_mosaic.version = 11 : i64} {
  func.func @kernel(%arg0: i32, %arg1: memref<16x2x7x64xf32, #tpu.memory_space<vmem>>, %arg2: memref<16x7x32xf32, #tpu.memory_space<vmem>>) attributes {dimension_semantics = [#tpu.dimension_semantics<parallel>], iteration_bounds = array<i64: 1>, scalar_prefetch = 0 : i64, scratch_operands = 0 : i64, tpu.core_type = #tpu.core_type<tc>, window_params = [{transform_indices = @transform_0, window_bounds = array<i64: 16, 2, 7, 64>}, {transform_indices = @transform_1, window_bounds = array<i64: 16, 7, 32>}]} {
    %c0 = arith.constant 0 : index
    %c0_0 = arith.constant 0 : index
    %c0_1 = arith.constant 0 : index
    %c0_2 = arith.constant 0 : index
    %0 = vector.load %arg1[%c0, %c0_0, %c0_1, %c0_2] : memref<16x2x7x64xf32, #tpu.memory_space<vmem>>, vector<16x2x7x64xf32>
    %1 = vector.extract_strided_slice %0 {offsets = [0, 0, 0, 0], sizes = [16, 1, 7, 64], strides = [1, 1, 1, 1]} : vector<16x2x7x64xf32> to vector<16x1x7x64xf32>
    %2 = vector.shape_cast %1 : vector<16x1x7x64xf32> to vector<16x7x64xf32>
    %3 = vector.extract_strided_slice %0 {offsets = [0, 1, 0, 0], sizes = [16, 1, 7, 64], strides = [1, 1, 1, 1]} : vector<16x2x7x64xf32> to vector<16x1x7x64xf32>
    %4 = vector.shape_cast %3 : vector<16x1x7x64xf32> to vector<16x7x64xf32>
    %5 = arith.maximumf %2, %4 : vector<16x7x64xf32>
    %6 = vector.extract_strided_slice %5 {offsets = [0, 0, 0], sizes = [16, 7, 32], strides = [1, 1, 1]} : vector<16x7x64xf32> to vector<16x7x32xf32>
    %7 = vector.extract_strided_slice %5 {offsets = [0, 0, 32], sizes = [16, 7, 32], strides = [1, 1, 1]} : vector<16x7x64xf32> to vector<16x7x32xf32>
    %8 = arith.maximumf %6, %7 : vector<16x7x32xf32>
    %c0_3 = arith.constant 0 : index
    %c0_4 = arith.constant 0 : index
    %c0_5 = arith.constant 0 : index
    %9 = vector.load %arg2[%c0_3, %c0_4, %c0_5] : memref<16x7x32xf32, #tpu.memory_space<vmem>>, vector<16x7x32xf32>
    tpu.vector_store %arg2[%c0_3, %c0_4, %c0_5], %8 {strides = array<i32>} : memref<16x7x32xf32, #tpu.memory_space<vmem>>, vector<16x7x32xf32>,
    return
  }
  func.func @transform_0(%arg0: i32) -> (i32, i32, i32, i32) {
    %c0_i32 = arith.constant 0 : i32
    %c0_i32_0 = arith.constant 0 : i32
    %c0_i32_1 = arith.constant 0 : i32
    %c0_i32_2 = arith.constant 0 : i32
    return %arg0, %c0_i32, %c0_i32_0, %c0_i32_1 : i32, i32, i32, i32
  }
  func.func @transform_1(%arg0: i32) -> (i32, i32, i32) {
    %c0_i32 = arith.constant 0 : i32
    %c0_i32_0 = arith.constant 0 : i32
    %c0_i32_1 = arith.constant 0 : i32
    return %arg0, %c0_i32, %c0_i32_0 : i32, i32, i32
  }
}

module attributes {stable_mosaic.version = 11 : i64} {
  func.func @_fc_head_kernel(%arg0: i32, %arg1: memref<8x1568xf32, #tpu.memory_space<vmem>>, %arg2: memref<1568x128xbf16, #tpu.memory_space<vmem>>, %arg3: memref<1x128xf32, #tpu.memory_space<vmem>>, %arg4: memref<128x10xbf16, #tpu.memory_space<vmem>>, %arg5: memref<1x10xf32, #tpu.memory_space<vmem>>, %arg6: memref<8x10xf32, #tpu.memory_space<vmem>>) attributes {dimension_semantics = [#tpu.dimension_semantics<parallel>], iteration_bounds = array<i64: 1>, scalar_prefetch = 0 : i64, scratch_operands = 0 : i64, tpu.core_type = #tpu.core_type<tc>, window_params = [{transform_indices = @transform_0, window_bounds = array<i64: 8, 1568>}, {pipeline_mode = #tpu.pipeline_mode<synchronous>, transform_indices = @transform_1, window_bounds = array<i64: 1568, 128>}, {pipeline_mode = #tpu.pipeline_mode<synchronous>, transform_indices = @transform_2, window_bounds = array<i64: 1, 128>}, {pipeline_mode = #tpu.pipeline_mode<synchronous>, transform_indices = @transform_3, window_bounds = array<i64: 128, 10>}, {pipeline_mode = #tpu.pipeline_mode<synchronous>, transform_indices = @transform_4, window_bounds = array<i64: 1, 10>}, {transform_indices = @transform_5, window_bounds = array<i64: 8, 10>}]} {
    %c0 = arith.constant 0 : index
    %c0_0 = arith.constant 0 : index
    %0 = vector.load %arg1[%c0, %c0_0] : memref<8x1568xf32, #tpu.memory_space<vmem>>, vector<8x1568xf32>
    %1 = arith.truncf %0 : vector<8x1568xf32> to vector<8x1568xbf16>
    %c0_1 = arith.constant 0 : index
    %c0_2 = arith.constant 0 : index
    %2 = vector.load %arg2[%c0_1, %c0_2] : memref<1568x128xbf16, #tpu.memory_space<vmem>>, vector<1568x128xbf16>
    %cst = arith.constant dense<0.000000e+00> : vector<8x128xf32>
    %3 = tpu.matmul %1, %2, %cst {dimension_numbers = #tpu.dot_dimension_numbers<[1], [0], [0], [1], [0, 0, 1, 1], [], []>} : vector<8x1568xbf16>, vector<1568x128xbf16>, vector<8x128xf32> -> vector<8x128xf32>
    %c0_3 = arith.constant 0 : index
    %c0_4 = arith.constant 0 : index
    %4 = vector.load %arg3[%c0_3, %c0_4] : memref<1x128xf32, #tpu.memory_space<vmem>>, vector<1x128xf32>
    %5 = vector.broadcast %4 : vector<1x128xf32> to vector<8x128xf32>
    %6 = arith.addf %3, %5 : vector<8x128xf32>
    %cst_5 = arith.constant 0.000000e+00 : f32
    %7 = vector.broadcast %cst_5 : f32 to vector<8x128xf32>
    %8 = arith.maximumf %6, %7 : vector<8x128xf32>
    %9 = arith.truncf %8 : vector<8x128xf32> to vector<8x128xbf16>
    %c0_6 = arith.constant 0 : index
    %c0_7 = arith.constant 0 : index
    %10 = vector.load %arg4[%c0_6, %c0_7] : memref<128x10xbf16, #tpu.memory_space<vmem>>, vector<128x10xbf16>
    %cst_8 = arith.constant dense<0.000000e+00> : vector<8x10xf32>
    %11 = tpu.matmul %9, %10, %cst_8 {dimension_numbers = #tpu.dot_dimension_numbers<[1], [0], [0], [1], [0, 0, 1, 1], [], []>} : vector<8x128xbf16>, vector<128x10xbf16>, vector<8x10xf32> -> vector<8x10xf32>
    %c0_9 = arith.constant 0 : index
    %c0_10 = arith.constant 0 : index
    %12 = vector.load %arg5[%c0_9, %c0_10] : memref<1x10xf32, #tpu.memory_space<vmem>>, vector<1x10xf32>
    %13 = vector.broadcast %12 : vector<1x10xf32> to vector<8x10xf32>
    %14 = arith.addf %11, %13 : vector<8x10xf32>
    %c0_11 = arith.constant 0 : index
    %c0_12 = arith.constant 0 : index
    %15 = vector.load %arg6[%c0_11, %c0_12] : memref<8x10xf32, #tpu.memory_space<vmem>>, vector<8x10xf32>
    tpu.vector_store %arg6[%c0_11, %c0_12], %14 {strides = array<i32>} : memref<8x10xf32, #tpu.memory_space<vmem>>, vector<8x10xf32>,
    return
  }
  func.func @transform_0(%arg0: i32) -> (i32, i32) {
    %c0_i32 = arith.constant 0 : i32
    %c0_i32_0 = arith.constant 0 : i32
    return %arg0, %c0_i32 : i32, i32
  }
  func.func @transform_1(%arg0: i32) -> (i32, i32) {
    %c0_i32 = arith.constant 0 : i32
    %c0_i32_0 = arith.constant 0 : i32
    %c0_i32_1 = arith.constant 0 : i32
    return %c0_i32, %c0_i32_0 : i32, i32
  }
  func.func @transform_2(%arg0: i32) -> (i32, i32) {
    %c0_i32 = arith.constant 0 : i32
    %c0_i32_0 = arith.constant 0 : i32
    %c0_i32_1 = arith.constant 0 : i32
    return %c0_i32, %c0_i32_0 : i32, i32
  }
  func.func @transform_3(%arg0: i32) -> (i32, i32) {
    %c0_i32 = arith.constant 0 : i32
    %c0_i32_0 = arith.constant 0 : i32
    %c0_i32_1 = arith.constant 0 : i32
    return %c0_i32, %c0_i32_0 : i32, i32
  }
  func.func @transform_4(%arg0: i32) -> (i32, i32) {
    %c0_i32 = arith.constant 0 : i32
    %c0_i32_0 = arith.constant 0 : i32
    %c0_i32_1 = arith.constant 0 : i32
    return %c0_i32, %c0_i32_0 : i32, i32
  }
  func.func @transform_5(%arg0: i32) -> (i32, i32) {
    %c0_i32 = arith.constant 0 : i32
    %c0_i32_0 = arith.constant 0 : i32
    return %arg0, %c0_i32 : i32, i32
  }
}

</mosaic_0001>

<bundles_post_ra>
// kernel: simple_cnn_forward.5
= control target key start
LH: loop header
LB: loop body
LE: loop exit
PB: predicated region body
PF: predicated region fallthrough
CT: control target
= control target key end

     0   :  { %s700_s12 = smov 0   ;;  %s852_s0 = inlined_call_operand.vmem [shape: f32[2,30,30,1], index: 0, kind: input, shape index: {}]   ;;  %s853_s1 = inlined_call_operand.vmem [shape: bf16[3,3,1,16], index: 1, kind: input, shape index: {}]   ;;  %s854_s2 = inlined_call_operand.vmem [shape: f32[1,16], index: 2, kind: input, shape index: {}]   ;;  %s855_s3 = inlined_call_operand.vmem [shape: f32[2,28,28,16], index: 3, kind: output, shape index: {}]  }
   0x1 LB: > { %s597_s13 = sadd.s32 4294967295, %s673_s12   ;;  %p601_p0 = scmp.ge.s32.totalorder %s673_s12, 1  ;;  %s673_s12 = sphi %s700_s12, %s13_s12  }
   0x2   : > { %p137_p1 = scmp.lt.s32.totalorder %s673_s12, 3 }
   0x4   : > { %p138_p2 = pnand %p601_p0, %p137_p1 }
   0x5   : > { %p161_p3 = scmp.lt.s32.totalorder (!%p138_p2), %s597_s13, 1  ;;  %s723_s24 = smov (!%p138_p2), 0  }
   0x6   : > { %141 = sbr.rel (%p138_p2) target bundleno = 232 (0xe8), region = 32 }
   0xb   : > { %v711_v0 = vld [vmem:[%s854_s2] sm:$0x1]  ;;  %s857_s13 = smov (!%p161_p3, %s597_s13), 1 }
   0xc   : > { %s641_s16 = smul.u32 960, %s857_s13 }
   0xd   : > { %s642_s17 = smul.u32 896, %s857_s13 }
   0xe   : > { %s716_s20 = scalar_lea.vmem %s852_s0, %s641_s16 }
   0xf   : > { %s721_s23 = scalar_lea.vmem %s855_s3, %s642_s17 }
  0x10 LB: >> { %v679_v1 = vmov 0   ;;  %s604_s25 = sshll.u32 %s677_s24, 5  ;;  %v605_v41 = vld [vmem:[%s853_s1 + $0x1] sm:$0x1]  ;;  %v184_v44 = vld [vmem:[%s853_s1] sm:$0x1]  ;;  %s677_s24 = sphi %s723_s24, %s177_s24  }
  0x11   : >> { %662 = vset.pattern.permute.xlu2 %v679_v1  ;;  %661 = vset.pattern.permute.xlu1 %v679_v1  ;;  %s732_s26 = scalar_lea.vmem %s716_s20, %s604_s25  ;;  %v221_v46 = vunpack.c.l.bf16 %v605_v41  ;;  %v185_v47 = vunpack.c.l.bf16 %v184_v44  ;;  %s835_s19 = scalar_lea.vmem %s721_s23, %s604_s25  ;;  %vm521_vm0 = vcmask 130048   ;;  %vm525_vm1 = vcmask 125952  }
  0x12   : >> { %660 = vset.pattern.permute.xlu0 %v679_v1  ;;  %v215_v2 = vld [vmem:[%s732_s26 + $0x1] sm:$0xff]  ;;  %v182_v3 = vld [vmem:[%s732_s26 + $0x10] sm:$0xff]  ;;  %v183_v6 = vld [vmem:[%s732_s26 + $0x18] sm:$0xf]  ;;  %s177_s24 = sadd.s32 1, %s677_s24  }
  0x13   : >> { %v180_v4 = vld [vmem:[%s732_s26] sm:$0xff]  ;;  %224 = vperm.xlu2 %662, %v215_v2   ;;  %198 = vperm.xlu1 %661, %v182_v3   ;;  %v216_v5 = vld [vmem:[%s732_s26 + $0x9] sm:$0xff]  ;;  %v218_v9 = vld [vmem:[%s732_s26 + $0x19] sm:$0xf]  ;;  %v242_v48 = vperm.slane %v221_v46, 0  ;;  %v206_v49 = vperm.slane %v185_v47, 0 }
  0x14   : >> { %188 = vperm.xlu0 %660, %v180_v4   ;;  %v181_v7 = vld [vmem:[%s732_s26 + $0x8] sm:$0xff]  ;;  %v217_v10 = vld [vmem:[%s732_s26 + $0x11] sm:$0xff]  ;;  %v254_v11 = vld [vmem:[%s732_s26 + $0x1a] sm:$0xf]  ;;  %p174_p4 = scmp.ge.s32.totalorder %s177_s24, 28  }
  0x15   : >> { %v251_v8 = vld [vmem:[%s732_s26 + $0x2] sm:$0xff]  ;;  %v253_v12 = vld [vmem:[%s732_s26 + $0x12] sm:$0xff]  ;;  %v252_v13 = vld [vmem:[%s732_s26 + $0xa] sm:$0xff] }
  0x16   : >> { %v610_v14 = vld [vmem:[%s732_s26 + $0x30] sm:$0xff]  ;;  %v609_v15 = vld [vmem:[%s732_s26 + $0x28] sm:$0xff]  ;;  %v608_v16 = vld [vmem:[%s732_s26 + $0x20] sm:$0xff] }
  0x17   : >> { %v614_v17 = vld [vmem:[%s732_s26 + $0x29] sm:$0xff]  ;;  %v613_v18 = vld [vmem:[%s732_s26 + $0x21] sm:$0xff]  ;;  %v611_v19 = vld [vmem:[%s732_s26 + $0x38] sm:$0xf] }
  0x18   : >> { %v618_v20 = vld [vmem:[%s732_s26 + $0x22] sm:$0xff]  ;;  %v616_v21 = vld [vmem:[%s732_s26 + $0x39] sm:$0xf]  ;;  %v615_v22 = vld [vmem:[%s732_s26 + $0x31] sm:$0xff] }
  0x19   : >> { %v621_v23 = vld [vmem:[%s732_s26 + $0x3a] sm:$0xf]  ;;  %v620_v24 = vld [vmem:[%s732_s26 + $0x32] sm:$0xff]  ;;  %v619_v25 = vld [vmem:[%s732_s26 + $0x2a] sm:$0xff] }
  0x1a   : >> { %v626_v26 = vld [vmem:[%s732_s26 + $0x50] sm:$0xff]  ;;  %v625_v27 = vld [vmem:[%s732_s26 + $0x48] sm:$0xff]  ;;  %v624_v28 = vld [vmem:[%s732_s26 + $0x40] sm:$0xff] }
  0x1b   : >> { %229 = vperm.xlu2 %662, %v216_v5   ;;  %203 = vperm.xlu1 %661, %v183_v6   ;;  %v630_v29 = vld [vmem:[%s732_s26 + $0x49] sm:$0xff]  ;;  %v629_v30 = vld [vmem:[%s732_s26 + $0x41] sm:$0xff]  ;;  %v627_v31 = vld [vmem:[%s732_s26 + $0x58] sm:$0xf] }
  0x1c   : >> { %193 = vperm.xlu0 %660, %v181_v7   ;;  %v634_v32 = vld [vmem:[%s732_s26 + $0x42] sm:$0xff]  ;;  %v632_v33 = vld [vmem:[%s732_s26 + $0x59] sm:$0xf]  ;;  %v631_v34 = vld [vmem:[%s732_s26 + $0x51] sm:$0xff] }
  0x1d   : >> { %v637_v35 = vld [vmem:[%s732_s26 + $0x5a] sm:$0xf]  ;;  %v636_v36 = vld [vmem:[%s732_s26 + $0x52] sm:$0xff]  ;;  %v635_v37 = vld [vmem:[%s732_s26 + $0x4a] sm:$0xff] }
  0x1e   : >> { %v606_v6 = vld [vmem:[%s853_s1 + $0x2] sm:$0x1] }
  0x23   : >> { %260 = vperm.xlu2 %662, %v251_v8   ;;  %239 = vperm.xlu1 %661, %v218_v9   ;;  %v612_v8 = vld [vmem:[%s853_s1 + $0x3] sm:$0x1]  ;;  %v257_v9 = vunpack.c.l.bf16 %v606_v6 }
  0x24   : >> { %234 = vperm.xlu0 %660, %v217_v10   ;;  %v617_v10 = vld [vmem:[%s853_s1 + $0x4] sm:$0x1] }
  0x2b   : >> { %275 = vperm.xlu2 %662, %v254_v11   ;;  %270 = vperm.xlu1 %661, %v253_v12  }
  0x2c   : >> { %265 = vperm.xlu0 %660, %v252_v13   ;;  %v296_v13 = vunpack.c.l.bf16 %v612_v8 }
  0x33   : >> { %309 = vperm.xlu2 %662, %v610_v14   ;;  %304 = vperm.xlu1 %661, %v609_v15   ;;  %v278_v15 = vperm.slane %v257_v9, 0 }
  0x34   : >> { %299 = vperm.xlu0 %660, %v608_v16   ;;  %v332_v16 = vunpack.c.l.bf16 %v617_v10 }
  0x3b   : >> { %340 = vperm.xlu2 %662, %v614_v17   ;;  %335 = vperm.xlu1 %661, %v613_v18   ;;  %v622_v18 = vld [vmem:[%s853_s1 + $0x5] sm:$0x1] }
  0x3c   : >> { %314 = vperm.xlu0 %660, %v611_v19  }
  0x43   : >> { %371 = vperm.xlu2 %662, %v618_v20   ;;  %350 = vperm.xlu1 %661, %v616_v21   ;;  %v317_v20 = vperm.slane %v296_v13, 0  ;;  %v628_v21 = vld [vmem:[%s853_s1 + $0x6] sm:$0x1] }
  0x44   : >> { %345 = vperm.xlu0 %660, %v615_v22  }
  0x4b   : >> { %386 = vperm.xlu2 %662, %v621_v23   ;;  %381 = vperm.xlu1 %661, %v620_v24   ;;  %v353_v24 = vperm.slane %v332_v16, 0 }
  0x4c   : >> { %376 = vperm.xlu0 %660, %v619_v25   ;;  %v368_v25 = vunpack.c.l.bf16 %v622_v18 }
  0x53   : >> { %420 = vperm.xlu2 %662, %v626_v26   ;;  %415 = vperm.xlu1 %661, %v625_v27  }
  0x54   : >> { %410 = vperm.xlu0 %660, %v624_v28  }
  0x5b   : >> { %451 = vperm.xlu2 %662, %v630_v29   ;;  %446 = vperm.xlu1 %661, %v629_v30   ;;  %v407_v29 = vunpack.c.l.bf16 %v628_v21 }
  0x5c   : >> { %425 = vperm.xlu0 %660, %v627_v31   ;;  %v633_v31 = vld [vmem:[%s853_s1 + $0x7] sm:$0x1] }
  0x63   : >> { %482 = vperm.xlu2 %662, %v634_v32   ;;  %461 = vperm.xlu1 %661, %v632_v33   ;;  %v638_v32 = vld [vmem:[%s853_s1 + $0x8] sm:$0x1] }
  0x64   : >> { %456 = vperm.xlu0 %660, %v631_v34   ;;  %v479_v44 = vunpack.c.l.bf16 %v638_v32 }
  0x66   : >> { %v500_v8 = vperm.slane %v479_v44, 0 }
  0x6b   : >> { %497 = vperm.xlu2 %662, %v637_v35   ;;  %492 = vperm.xlu1 %661, %v636_v36   ;;  %v389_v35 = vperm.slane %v368_v25, 0 }
  0x6c   : >> { %487 = vperm.xlu0 %660, %v635_v37  }
  0x6d   : >> { %v225_v38 = vpop.permute.xlu2 %224 }
  0x6e   : >> { %v243_v11 = vmul.f32 %v242_v48, %v225_v38  ;;  %v443_v38 = vunpack.c.l.bf16 %v633_v31 }
  0x75   : >> { %v230_v39 = vpop.permute.xlu2 %229 }
  0x76   : >> { %v244_v52 = vmul.f32 %v242_v48, %v230_v39 }
  0x7d   : >> { %v261_v40 = vpop.permute.xlu2 %260 }
  0x7e   : >> { %v279_v23 = vmul.f32 %v278_v15, %v261_v40  ;;  %v428_v40 = vperm.slane %v407_v29, 0 }
  0x85   : >> { %v773_v42 = vpop.permute.xlu2 %275  ;;  %v775_v43 = vpop.permute.xlu1 %198 }
  0x86   : >> { %v189_v45 = vpop.permute.xlu0 %188  ;;  %v282_v46 = vmul.f32 %v278_v15, %v773_v42 }
  0x87   : >> { %v207_v12 = vmul.f32 %v206_v49, %v189_v45 }
  0x89   : >> { %v247_v19 = vadd.f32 %v243_v11, %v207_v12 }
  0x8b   : >> { %v283_v28 = vadd.f32 %v279_v23, %v247_v19 }
  0x8d   : >> { %v204_v50 = vpop.permute.xlu1 %203  ;;  %v780_v53 = vpop.permute.xlu2 %309 }
  0x8e   : >> { %v194_v51 = vpop.permute.xlu0 %193  ;;  %v210_v34 = vmul.f32 %v206_v49, %v204_v50 }
  0x8f   : >> { %v208_v54 = vmul.f32 %v206_v49, %v194_v51 }
  0x91   : >> { %v782_v55 = vadd.f32 %v244_v52, %v208_v54  ;;  %v209_v54 = vmul.f32 %v206_v49, %v775_v43  ;;  %v510_v43 = vperm.slane %v711_v0, 0 }
  0x95   : >> { %v240_v56 = vpop.permute.xlu1 %239  ;;  %v784_v58 = vpop.permute.xlu2 %340 }
  0x96   : >> { %v235_v57 = vpop.permute.xlu0 %234  ;;  %v246_v27 = vmul.f32 %v242_v48, %v240_v56 }
  0x97   : >> { %v245_v45 = vmul.f32 %v242_v48, %v235_v57 }
  0x98   : >> { %v250_v39 = vadd.f32 %v246_v27, %v210_v34 }
  0x99   : >> { %v249_v10 = vadd.f32 %v245_v45, %v209_v54 }
  0x9a   : >> { %v286_v50 = vadd.f32 %v282_v46, %v250_v39 }
  0x9d   : >> { %v271_v59 = vpop.permute.xlu1 %270  ;;  %v372_v61 = vpop.permute.xlu2 %371 }
  0x9e   : >> { %v266_v60 = vpop.permute.xlu0 %265  ;;  %v390_v47 = vmul.f32 %v389_v35, %v372_v61  ;;  %v281_v56 = vmul.f32 %v278_v15, %v271_v59  ;;  %v320_v59 = vmul.f32 %v317_v20, %v780_v53 }
  0x9f   : >> { %v280_v11 = vmul.f32 %v278_v15, %v266_v60 }
  0xa0   : >> { %v285_v42 = vadd.f32 %v281_v56, %v249_v10 }
  0xa2   : >> { %v324_v25 = vadd.f32 %v320_v59, %v285_v42 }
  0xa5   : >> { %v786_v62 = vpop.permute.xlu1 %304  ;;  %v788_v1 = vpop.permute.xlu2 %386 }
  0xa6   : >> { %v300_v63 = vpop.permute.xlu0 %299  ;;  %v319_v61 = vmul.f32 %v317_v20, %v786_v62  ;;  %v393_v60 = vmul.f32 %v389_v35, %v788_v1 }
  0xa7   : >> { %v318_v26 = vmul.f32 %v317_v20, %v300_v63  ;;  %v464_v63 = vperm.slane %v443_v38, 0 }
  0xa9   : >> { %v322_v36 = vadd.f32 %v318_v26, %v283_v28  ;;  %v355_v28 = vmul.f32 %v353_v24, %v784_v58 }
  0xad   : >> { %v336_v2 = vpop.permute.xlu1 %335  ;;  %v795_v7 = vpop.permute.xlu2 %420 }
  0xae   : >> { %v315_v3 = vpop.permute.xlu0 %314  ;;  %v354_v30 = vmul.f32 %v353_v24, %v336_v2 }
  0xaf   : >> { %v321_v51 = vmul.f32 %v317_v20, %v315_v3 }
  0xb0   : >> { %v358_v41 = vadd.f32 %v354_v30, %v322_v36 }
  0xb1   : >> { %v325_v13 = vadd.f32 %v321_v51, %v286_v50 }
  0xb2   : >> { %v394_v9 = vadd.f32 %v390_v47, %v358_v41 }
  0xb5   : >> { %v351_v4 = vpop.permute.xlu1 %350  ;;  %v813_v22 = vpop.permute.xlu2 %451 }
  0xb6   : >> { %v790_v5 = vpop.permute.xlu0 %345  ;;  %v357_v6 = vmul.f32 %v353_v24, %v351_v4  ;;  %v284_v4 = vadd.f32 %v280_v11, %v782_v55  ;;  %v466_v44 = vmul.f32 %v464_v63, %v813_v22 }
  0xb7   : >> { %v356_v15 = vmul.f32 %v353_v24, %v790_v5  ;;  %v431_v24 = vmul.f32 %v428_v40, %v795_v7 }
  0xb8   : >> { %v361_v3 = vadd.f32 %v357_v6, %v325_v13  ;;  %v323_v23 = vadd.f32 %v319_v61, %v284_v4 }
  0xb9   : >> { %v360_v55 = vadd.f32 %v356_v15, %v324_v25 }
  0xba   : >> { %v397_v27 = vadd.f32 %v393_v60, %v361_v3  ;;  %v359_v32 = vadd.f32 %v355_v28, %v323_v23 }
  0xbd   : >> { %v803_v14 = vpop.permute.xlu1 %381  ;;  %v483_v2 = vpop.permute.xlu2 %482 }
  0xbe   : >> { %v805_v17 = vpop.permute.xlu0 %376  ;;  %v501_v18 = vmul.f32 %v500_v8, %v483_v2  ;;  %v392_v62 = vmul.f32 %v389_v35, %v803_v14 }
  0xbf   : >> { %v391_v29 = vmul.f32 %v389_v35, %v805_v17 }
  0xc0   : >> { %v396_v34 = vadd.f32 %v392_v62, %v360_v55 }
  0xc1   : >> { %v395_v17 = vadd.f32 %v391_v29, %v359_v32 }
  0xc2   : >> { %v435_v41 = vadd.f32 %v431_v24, %v396_v34 }
  0xc5   : >> { %v416_v33 = vpop.permute.xlu1 %415  ;;  %v498_v30 = vpop.permute.xlu2 %497 }
  0xc6   : >> { %v411_v37 = vpop.permute.xlu0 %410  ;;  %v430_v14 = vmul.f32 %v428_v40, %v416_v33  ;;  %v504_v36 = vmul.f32 %v500_v8, %v498_v30 }
  0xc7   : >> { %v429_v52 = vmul.f32 %v428_v40, %v411_v37 }
  0xc8   : >> { %v434_v38 = vadd.f32 %v430_v14, %v395_v17 }
  0xc9   : >> { %v433_v16 = vadd.f32 %v429_v52, %v394_v9 }
  0xca   : >> { %v470_v52 = vadd.f32 %v466_v44, %v434_v38 }
  0xcd   : >> { %v447_v12 = vpop.permute.xlu1 %446 }
  0xce   : >> { %v465_v48 = vmul.f32 %v464_v63, %v447_v12  ;;  %v426_v57 = vpop.permute.xlu0 %425 }
  0xcf   : >> { %v432_v21 = vmul.f32 %v428_v40, %v426_v57 }
  0xd0   : >> { %v469_v49 = vadd.f32 %v465_v48, %v433_v16 }
  0xd1   : >> { %v436_v5 = vadd.f32 %v432_v21, %v397_v27 }
  0xd2   : >> { %v505_v19 = vadd.f32 %v501_v18, %v469_v49 }
  0xd4   : >> { %v512_v26 = vadd.f32 %v510_v43, %v505_v19 }
  0xd5   : >> { %v462_v53 = vpop.permute.xlu1 %461 }
  0xd6   : >> { %v516_v1 = vmax.f32 %v512_v26, 0.0  ;;  %v468_v20 = vmul.f32 %v464_v63, %v462_v53  ;;  %v457_v31 = vpop.permute.xlu0 %456 }
  0xd7   : >> { %v467_v37 = vmul.f32 %v464_v63, %v457_v31 }
  0xd8   : >> { %522 = vst.msk [vmem:[%s835_s19] sm:$0xff] %vm521_vm0, %v516_v1  ;;  %v472_v58 = vadd.f32 %v468_v20, %v436_v5 }
  0xd9   : >> { %v471_v46 = vadd.f32 %v467_v37, %v435_v41 }
  0xda   : >> { %v508_v35 = vadd.f32 %v504_v36, %v472_v58 }
  0xdc   : >> { %v515_v39 = vadd.f32 %v510_v43, %v508_v35 }
  0xdd   : >> { %v493_v33 = vpop.permute.xlu1 %492 }
  0xde   : >> { %v519_v45 = vmax.f32 %v515_v39, 0.0  ;;  %v503_v47 = vmul.f32 %v500_v8, %v493_v33  ;;  %v488_v51 = vpop.permute.xlu0 %487 }
  0xdf   : >> { %v502_v54 = vmul.f32 %v500_v8, %v488_v51 }
  0xe0   : >> { %526 = vst.msk [vmem:[%s835_s19 + $0x18] sm:$0xf] %vm525_vm1, %v519_v45  ;;  %v507_v56 = vadd.f32 %v503_v47, %v471_v46 }
  0xe1   : >> { %v506_v7 = vadd.f32 %v502_v54, %v470_v52 }
  0xe2   : >> { %v514_v40 = vadd.f32 %v510_v43, %v507_v56 }
  0xe3   : >> { %v513_v2 = vadd.f32 %v510_v43, %v506_v7  ;;  %176 = sbr.rel (!%p174_p4) target bundleno = 16 (0x10), region = 81 }
  0xe4   : >> { %v518_v50 = vmax.f32 %v514_v40, 0.0 }
  0xe5   : >> { %v517_v6 = vmax.f32 %v513_v2, 0.0 }
  0xe6   : >> { %524 = vst.msk [vmem:[%s835_s19 + $0x10] sm:$0xff] %vm521_vm0, %v518_v50 }
  0xe7   : >> { %523 = vst.msk [vmem:[%s835_s19 + $0x8] sm:$0xff] %vm521_vm0, %v517_v6 }
  0xe8 PF: > { %s13_s12 = sadd.s32 1, %s673_s12  }
  0xe9   : > { %p10_p5 = scmp.ge.s32.totalorder %s13_s12, 4  }
  0xeb   :  { %12 = sbr.rel (!%p10_p5) target bundleno = 1 (0x1), region = 92 }

// kernel: simple_cnn_forward.6
= control target key start
LH: loop header
LB: loop body
LE: loop exit
PB: predicated region body
PF: predicated region fallthrough
CT: control target
= control target key end

     0   :  { %s591_s14 = smov 112   ;;  %vm520_vm0 = vcmask 130048   ;;  %vm522_vm1 = vcmask 128000   ;;  %s1562_s0 = inlined_call_operand.vmem [shape: f32[32,2,14,32], index: 0, kind: input, shape index: {}]   ;;  %s1563_s1 = inlined_call_operand.vmem [shape: f32[32,14,16], index: 1, kind: output, shape index: {}]  }
   0x1   :  { %v8_v0 = vld [vmem:[%s1562_s0] sm:$0xff]  ;;  %v10_v1 = vld [vmem:[%s1562_s0 + $0x10] sm:$0xff]  ;;  %v9_v6 = vld [vmem:[%s1562_s0 + $0x8] sm:$0x3f] }
   0x2   :  { %v12_v2 = vld [vmem:[%s1562_s0 + $0x20] sm:$0xff]  ;;  %v611_v3 = vmax.f32 %v8_v0, %v10_v1  ;;  %v14_v4 = vld [vmem:[%s1562_s0 + $0x30] sm:$0xff]  ;;  %v11_v7 = vld [vmem:[%s1562_s0 + $0x18] sm:$0x3f] }
   0x3   :  { %v616_v5 = vmax.f32 %v12_v2, %v14_v4  ;;  %v16_v8 = vld [vmem:[%s1562_s0 + $0x40] sm:$0xff]  ;;  %v13_v9 = vld [vmem:[%s1562_s0 + $0x28] sm:$0x3f]  ;;  %v15_v10 = vld [vmem:[%s1562_s0 + $0x38] sm:$0x3f]  ;;  %v642_v13 = vmax.f32 %v9_v6, %v11_v7 }
   0x4   :  { %264 = vrot.lane.b32.xlu0 %v611_v3, %s591_s14  ;;  %v18_v11 = vld [vmem:[%s1562_s0 + $0x50] sm:$0xff]  ;;  %v644_v14 = vmax.f32 %v13_v9, %v15_v10  ;;  %v17_v15 = vld [vmem:[%s1562_s0 + $0x48] sm:$0x3f]  ;;  %v19_v16 = vld [vmem:[%s1562_s0 + $0x58] sm:$0x3f] }
   0x5   :  { %268 = vrot.lane.b32.xlu1 %v616_v5, %s591_s14  ;;  %v640_v12 = vmax.f32 %v16_v8, %v18_v11  ;;  %v20_v17 = vld [vmem:[%s1562_s0 + $0x60] sm:$0xff]  ;;  %v22_v18 = vld [vmem:[%s1562_s0 + $0x70] sm:$0xff]  ;;  %v664_v19 = vmax.f32 %v17_v15, %v19_v16  ;;  %v21_v20 = vld [vmem:[%s1562_s0 + $0x68] sm:$0x3f] }
   0x6   :  { %v23_v21 = vld [vmem:[%s1562_s0 + $0x78] sm:$0x3f]  ;;  %v672_v22 = vmax.f32 %v20_v17, %v22_v18  ;;  %v24_v24 = vld [vmem:[%s1562_s0 + $0x80] sm:$0xff]  ;;  %v26_v25 = vld [vmem:[%s1562_s0 + $0x90] sm:$0xff] }
   0x7   :  { %272 = vrot.lane.b32.xlu2 %v640_v12, %s591_s14  ;;  %v674_v23 = vmax.f32 %v21_v20, %v23_v21  ;;  %v25_v26 = vld [vmem:[%s1562_s0 + $0x88] sm:$0x3f]  ;;  %v27_v27 = vld [vmem:[%s1562_s0 + $0x98] sm:$0x3f]  ;;  %v694_v28 = vmax.f32 %v24_v24, %v26_v25  ;;  %v28_v29 = vld [vmem:[%s1562_s0 + $0xa0] sm:$0xff] }
   0x8   :  { %v30_v30 = vld [vmem:[%s1562_s0 + $0xb0] sm:$0xff]  ;;  %v702_v31 = vmax.f32 %v25_v26, %v27_v27  ;;  %v29_v33 = vld [vmem:[%s1562_s0 + $0xa8] sm:$0x3f]  ;;  %v31_v34 = vld [vmem:[%s1562_s0 + $0xb8] sm:$0x3f] }
   0x9   :  { %v704_v32 = vmax.f32 %v28_v29, %v30_v30  ;;  %v32_v35 = vld [vmem:[%s1562_s0 + $0xc0] sm:$0xff]  ;;  %v34_v36 = vld [vmem:[%s1562_s0 + $0xd0] sm:$0xff]  ;;  %v724_v37 = vmax.f32 %v29_v33, %v31_v34  ;;  %v33_v38 = vld [vmem:[%s1562_s0 + $0xc8] sm:$0x3f] }
   0xa   :  { %v35_v39 = vld [vmem:[%s1562_s0 + $0xd8] sm:$0x3f]  ;;  %v732_v40 = vmax.f32 %v32_v35, %v34_v36  ;;  %v36_v42 = vld [vmem:[%s1562_s0 + $0xe0] sm:$0xff]  ;;  %v38_v43 = vld [vmem:[%s1562_s0 + $0xf0] sm:$0xff] }
   0xb   :  { %v734_v41 = vmax.f32 %v33_v38, %v35_v39  ;;  %v37_v44 = vld [vmem:[%s1562_s0 + $0xe8] sm:$0x3f]  ;;  %v39_v45 = vld [vmem:[%s1562_s0 + $0xf8] sm:$0x3f]  ;;  %v754_v46 = vmax.f32 %v36_v42, %v38_v43  ;;  %v40_v47 = vld [vmem:[%s1562_s0 + $0x100] sm:$0xff] }
   0xc   :  { %266 = vrot.lane.b32.xlu0 %v642_v13, %s591_s14  ;;  %v42_v48 = vld [vmem:[%s1562_s0 + $0x110] sm:$0xff]  ;;  %v762_v49 = vmax.f32 %v37_v44, %v39_v45  ;;  %v41_v51 = vld [vmem:[%s1562_s0 + $0x108] sm:$0x3f]  ;;  %v43_v52 = vld [vmem:[%s1562_s0 + $0x118] sm:$0x3f] }
   0xd   :  { %270 = vrot.lane.b32.xlu1 %v644_v14, %s591_s14  ;;  %v764_v50 = vmax.f32 %v40_v47, %v42_v48  ;;  %v44_v53 = vld [vmem:[%s1562_s0 + $0x120] sm:$0xff]  ;;  %v46_v54 = vld [vmem:[%s1562_s0 + $0x130] sm:$0xff]  ;;  %v784_v55 = vmax.f32 %v41_v51, %v43_v52  ;;  %v45_v56 = vld [vmem:[%s1562_s0 + $0x128] sm:$0x3f] }
   0xe   :  { %v47_v57 = vld [vmem:[%s1562_s0 + $0x138] sm:$0x3f]  ;;  %v792_v58 = vmax.f32 %v44_v53, %v46_v54  ;;  %v48_v60 = vld [vmem:[%s1562_s0 + $0x140] sm:$0xff]  ;;  %v50_v61 = vld [vmem:[%s1562_s0 + $0x150] sm:$0xff] }
   0xf   :  { %274 = vrot.lane.b32.xlu2 %v664_v19, %s591_s14  ;;  %v794_v59 = vmax.f32 %v45_v56, %v47_v57  ;;  %v49_v62 = vld [vmem:[%s1562_s0 + $0x148] sm:$0x3f]  ;;  %v51_v63 = vld [vmem:[%s1562_s0 + $0x158] sm:$0x3f]  ;;  %v814_v0 = vmax.f32 %v48_v60, %v50_v61  ;;  %v52_v1 = vld [vmem:[%s1562_s0 + $0x160] sm:$0xff] }
  0x10   :  { %v54_v2 = vld [vmem:[%s1562_s0 + $0x170] sm:$0xff]  ;;  %v822_v4 = vmax.f32 %v49_v62, %v51_v63  ;;  %v53_v7 = vld [vmem:[%s1562_s0 + $0x168] sm:$0x3f]  ;;  %v55_v8 = vld [vmem:[%s1562_s0 + $0x178] sm:$0x3f] }
  0x11   :  { %v824_v6 = vmax.f32 %v52_v1, %v54_v2  ;;  %v56_v9 = vld [vmem:[%s1562_s0 + $0x180] sm:$0xff]  ;;  %v58_v10 = vld [vmem:[%s1562_s0 + $0x190] sm:$0xff]  ;;  %v844_v11 = vmax.f32 %v53_v7, %v55_v8  ;;  %v57_v15 = vld [vmem:[%s1562_s0 + $0x188] sm:$0x3f] }
  0x12   :  { %v59_v16 = vld [vmem:[%s1562_s0 + $0x198] sm:$0x3f]  ;;  %v852_v17 = vmax.f32 %v56_v9, %v58_v10  ;;  %v60_v20 = vld [vmem:[%s1562_s0 + $0x1a0] sm:$0xff]  ;;  %v62_v21 = vld [vmem:[%s1562_s0 + $0x1b0] sm:$0xff] }
  0x13   :  { %v854_v18 = vmax.f32 %v57_v15, %v59_v16  ;;  %v61_v24 = vld [vmem:[%s1562_s0 + $0x1a8] sm:$0x3f]  ;;  %v63_v25 = vld [vmem:[%s1562_s0 + $0x1b8] sm:$0x3f]  ;;  %v874_v26 = vmax.f32 %v60_v20, %v62_v21  ;;  %v64_v27 = vld [vmem:[%s1562_s0 + $0x1c0] sm:$0xff] }
  0x14   :  { %276 = vrot.lane.b32.xlu0 %v672_v22, %s591_s14  ;;  %v66_v29 = vld [vmem:[%s1562_s0 + $0x1d0] sm:$0xff]  ;;  %v882_v30 = vmax.f32 %v61_v24, %v63_v25  ;;  %v65_v34 = vld [vmem:[%s1562_s0 + $0x1c8] sm:$0x3f]  ;;  %v67_v35 = vld [vmem:[%s1562_s0 + $0x1d8] sm:$0x3f] }
  0x15   :  { %278 = vrot.lane.b32.xlu1 %v674_v23, %s591_s14  ;;  %v884_v33 = vmax.f32 %v64_v27, %v66_v29  ;;  %v68_v36 = vld [vmem:[%s1562_s0 + $0x1e0] sm:$0xff]  ;;  %v70_v38 = vld [vmem:[%s1562_s0 + $0x1f0] sm:$0xff]  ;;  %v904_v39 = vmax.f32 %v65_v34, %v67_v35  ;;  %v69_v42 = vld [vmem:[%s1562_s0 + $0x1e8] sm:$0x3f] }
  0x16   :  { %v71_v43 = vld [vmem:[%s1562_s0 + $0x1f8] sm:$0x3f]  ;;  %v912_v44 = vmax.f32 %v68_v36, %v70_v38  ;;  %v72_v47 = vld [vmem:[%s1562_s0 + $0x200] sm:$0xff]  ;;  %v74_v48 = vld [vmem:[%s1562_s0 + $0x210] sm:$0xff] }
  0x17   :  { %280 = vrot.lane.b32.xlu2 %v694_v28, %s591_s14  ;;  %v914_v45 = vmax.f32 %v69_v42, %v71_v43  ;;  %v73_v51 = vld [vmem:[%s1562_s0 + $0x208] sm:$0x3f]  ;;  %v75_v52 = vld [vmem:[%s1562_s0 + $0x218] sm:$0x3f]  ;;  %v934_v53 = vmax.f32 %v72_v47, %v74_v48  ;;  %v76_v54 = vld [vmem:[%s1562_s0 + $0x220] sm:$0xff] }
  0x18   :  { %v78_v56 = vld [vmem:[%s1562_s0 + $0x230] sm:$0xff]  ;;  %v942_v57 = vmax.f32 %v73_v51, %v75_v52  ;;  %v77_v61 = vld [vmem:[%s1562_s0 + $0x228] sm:$0x3f]  ;;  %v79_v62 = vld [vmem:[%s1562_s0 + $0x238] sm:$0x3f] }
  0x19   :  { %v944_v60 = vmax.f32 %v76_v54, %v78_v56  ;;  %v80_v63 = vld [vmem:[%s1562_s0 + $0x240] sm:$0xff]  ;;  %v82_v1 = vld [vmem:[%s1562_s0 + $0x250] sm:$0xff]  ;;  %v964_v2 = vmax.f32 %v77_v61, %v79_v62  ;;  %v81_v7 = vld [vmem:[%s1562_s0 + $0x248] sm:$0x3f] }
  0x1a   :  { %v83_v8 = vld [vmem:[%s1562_s0 + $0x258] sm:$0x3f]  ;;  %v972_v9 = vmax.f32 %v80_v63, %v82_v1  ;;  %v84_v15 = vld [vmem:[%s1562_s0 + $0x260] sm:$0xff]  ;;  %v86_v16 = vld [vmem:[%s1562_s0 + $0x270] sm:$0xff] }
  0x1b   :  { %v974_v10 = vmax.f32 %v81_v7, %v83_v8  ;;  %v85_v24 = vld [vmem:[%s1562_s0 + $0x268] sm:$0x3f]  ;;  %v87_v25 = vld [vmem:[%s1562_s0 + $0x278] sm:$0x3f]  ;;  %v995_v27 = vmax.f32 %v84_v15, %v86_v16  ;;  %v88_v29 = vld [vmem:[%s1562_s0 + $0x280] sm:$0xff] }
  0x1c   :  { %282 = vrot.lane.b32.xlu0 %v702_v31, %s591_s14  ;;  %v1007_v34 = vmax.f32 %v85_v24, %v87_v25  ;;  %v89_v36 = vld [vmem:[%s1562_s0 + $0x288] sm:$0x3f]  ;;  %v91_v38 = vld [vmem:[%s1562_s0 + $0x298] sm:$0x3f]  ;;  %v92_v47 = vld [vmem:[%s1562_s0 + $0x2a0] sm:$0xff] }
  0x1d   :  { %284 = vrot.lane.b32.xlu1 %v704_v32, %s591_s14  ;;  %v94_v48 = vld [vmem:[%s1562_s0 + $0x2b0] sm:$0xff]  ;;  %v1030_v51 = vmax.f32 %v89_v36, %v91_v38  ;;  %v93_v52 = vld [vmem:[%s1562_s0 + $0x2a8] sm:$0x3f]  ;;  %v96_v61 = vld [vmem:[%s1562_s0 + $0x2c0] sm:$0xff] }
  0x1e   :  { %v1042_v54 = vmax.f32 %v92_v47, %v94_v48  ;;  %v98_v62 = vld [vmem:[%s1562_s0 + $0x2d0] sm:$0xff]  ;;  %v97_v7 = vld [vmem:[%s1562_s0 + $0x2c8] sm:$0x3f]  ;;  %v99_v8 = vld [vmem:[%s1562_s0 + $0x2d8] sm:$0x3f] }
  0x1f   :  { %286 = vrot.lane.b32.xlu2 %v724_v37, %s591_s14  ;;  %v1065_v15 = vmax.f32 %v96_v61, %v98_v62  ;;  %v1078_v25 = vmax.f32 %v97_v7, %v99_v8 }
  0x24   :  { %288 = vrot.lane.b32.xlu0 %v732_v40, %s591_s14 }
  0x25   :  { %290 = vrot.lane.b32.xlu1 %v734_v41, %s591_s14 }
  0x27   :  { %292 = vrot.lane.b32.xlu2 %v754_v46, %s591_s14 }
  0x2c   :  { %294 = vrot.lane.b32.xlu0 %v762_v49, %s591_s14 }
  0x2d   :  { %296 = vrot.lane.b32.xlu1 %v764_v50, %s591_s14 }
  0x2f   :  { %298 = vrot.lane.b32.xlu2 %v784_v55, %s591_s14 }
  0x34   :  { %300 = vrot.lane.b32.xlu0 %v792_v58, %s591_s14 }
  0x35   :  { %302 = vrot.lane.b32.xlu1 %v794_v59, %s591_s14 }
  0x37   :  { %304 = vrot.lane.b32.xlu2 %v814_v0, %s591_s14 }
  0x3c   :  { %306 = vrot.lane.b32.xlu0 %v822_v4, %s591_s14 }
  0x3d   :  { %308 = vrot.lane.b32.xlu1 %v824_v6, %s591_s14 }
  0x3f   :  { %310 = vrot.lane.b32.xlu2 %v844_v11, %s591_s14 }
  0x44   :  { %312 = vrot.lane.b32.xlu0 %v852_v17, %s591_s14 }
  0x45   :  { %314 = vrot.lane.b32.xlu1 %v854_v18, %s591_s14 }
  0x47   :  { %316 = vrot.lane.b32.xlu2 %v874_v26, %s591_s14 }
  0x4c   :  { %318 = vrot.lane.b32.xlu0 %v882_v30, %s591_s14 }
  0x4d   :  { %320 = vrot.lane.b32.xlu1 %v884_v33, %s591_s14 }
  0x4f   :  { %322 = vrot.lane.b32.xlu2 %v904_v39, %s591_s14 }
  0x54   :  { %324 = vrot.lane.b32.xlu0 %v912_v44, %s591_s14 }
  0x55   :  { %326 = vrot.lane.b32.xlu1 %v914_v45, %s591_s14 }
  0x57   :  { %328 = vrot.lane.b32.xlu2 %v934_v53, %s591_s14 }
  0x5c   :  { %330 = vrot.lane.b32.xlu0 %v942_v57, %s591_s14 }
  0x5d   :  { %332 = vrot.lane.b32.xlu1 %v944_v60, %s591_s14 }
  0x5f   :  { %334 = vrot.lane.b32.xlu2 %v964_v2, %s591_s14 }
  0x61   :  { %v273_v20 = vpop.permute.xlu2 %272 }
  0x62   :  { %v460_v21 = vmax.f32 %v640_v12, %v273_v20  ;;  %v90_v12 = vld [vmem:[%s1562_s0 + $0x290] sm:$0xff]  ;;  %v100_v20 = vld [vmem:[%s1562_s0 + $0x2e0] sm:$0xff] }
  0x63   :  { %v1009_v35 = vmax.f32 %v88_v29, %v90_v12 }
  0x64   :  { %336 = vrot.lane.b32.xlu0 %v972_v9, %s591_s14  ;;  %526 = vst.msk [vmem:[%s1563_s1 + $0x20] sm:$0xff] %vm520_vm0, %v460_v21 }
  0x65   :  { %338 = vrot.lane.b32.xlu1 %v974_v10, %s591_s14 }
  0x67   :  { %340 = vrot.lane.b32.xlu2 %v995_v27, %s591_s14 }
  0x69   :  { %v275_v42 = vpop.permute.xlu2 %274 }
  0x6a   :  { %v461_v43 = vmax.f32 %v664_v19, %v275_v42  ;;  %v95_v19 = vld [vmem:[%s1562_s0 + $0x2b8] sm:$0x3f]  ;;  %v104_v42 = vld [vmem:[%s1562_s0 + $0x300] sm:$0xff] }
  0x6b   :  { %v1044_v56 = vmax.f32 %v93_v52, %v95_v19  ;;  %v105_v52 = vld [vmem:[%s1562_s0 + $0x308] sm:$0x3f] }
  0x6c   :  { %342 = vrot.lane.b32.xlu0 %v1007_v34, %s591_s14  ;;  %527 = vst.msk [vmem:[%s1563_s1 + $0x28] sm:$0x3f] %vm522_vm1, %v461_v43  ;;  %v106_v43 = vld [vmem:[%s1562_s0 + $0x310] sm:$0xff] }
  0x6d   :  { %344 = vrot.lane.b32.xlu1 %v1009_v35, %s591_s14  ;;  %v1123_v62 = vmax.f32 %v104_v42, %v106_v43 }
  0x6f   :  { %346 = vrot.lane.b32.xlu2 %v1030_v51, %s591_s14 }
  0x71   :  { %v281_v63 = vpop.permute.xlu2 %280 }
  0x72   :  { %v464_v1 = vmax.f32 %v694_v28, %v281_v63  ;;  %v102_v28 = vld [vmem:[%s1562_s0 + $0x2f0] sm:$0xff] }
  0x73   :  { %v1085_v12 = vmax.f32 %v100_v20, %v102_v28  ;;  %v111_v20 = vld [vmem:[%s1562_s0 + $0x338] sm:$0x3f] }
  0x74   :  { %348 = vrot.lane.b32.xlu0 %v1042_v54, %s591_s14  ;;  %530 = vst.msk [vmem:[%s1563_s1 + $0x40] sm:$0xff] %vm520_vm0, %v464_v1 }
  0x75   :  { %350 = vrot.lane.b32.xlu1 %v1044_v56, %s591_s14 }
  0x76   :  { %v265_v16 = vpop.permute.xlu0 %264 }
  0x77   :  { %v456_v21 = vmax.f32 %v611_v3, %v265_v16  ;;  %v269_v24 = vpop.permute.xlu1 %268  ;;  %352 = vrot.lane.b32.xlu2 %v1065_v15, %s591_s14  ;;  %v101_v3 = vld [vmem:[%s1562_s0 + $0x2e8] sm:$0x3f] }
  0x78   :  { %v458_v29 = vmax.f32 %v616_v5, %v269_v24  ;;  %v103_v5 = vld [vmem:[%s1562_s0 + $0x2f8] sm:$0x3f]  ;;  %v109_v16 = vld [vmem:[%s1562_s0 + $0x328] sm:$0x3f]  ;;  %v112_v24 = vld [vmem:[%s1562_s0 + $0x340] sm:$0xff] }
  0x79   :  { %521 = vst.msk [vmem:[%s1563_s1] sm:$0xff] %vm520_vm0, %v456_v21  ;;  %v287_v36 = vpop.permute.xlu2 %286  ;;  %v1110_v47 = vmax.f32 %v101_v3, %v103_v5  ;;  %v1168_v5 = vmax.f32 %v109_v16, %v111_v20 }
  0x7a   :  { %524 = vst.msk [vmem:[%s1563_s1 + $0x10] sm:$0xff] %vm520_vm0, %v458_v29  ;;  %v467_v38 = vmax.f32 %v724_v37, %v287_v36  ;;  %v107_v37 = vld [vmem:[%s1562_s0 + $0x318] sm:$0x3f] }
  0x7b   :  { %v1130_v1 = vmax.f32 %v105_v52, %v107_v37  ;;  %v118_v52 = vld [vmem:[%s1562_s0 + $0x370] sm:$0xff] }
  0x7c   :  { %354 = vrot.lane.b32.xlu0 %v1078_v25, %s591_s14  ;;  %533 = vst.msk [vmem:[%s1563_s1 + $0x58] sm:$0x3f] %vm522_vm1, %v467_v38 }
  0x7d   :  { %356 = vrot.lane.b32.xlu1 %v1085_v12, %s591_s14 }
  0x7e   :  { %v267_v48 = vpop.permute.xlu0 %266 }
  0x7f   :  { %v457_v19 = vmax.f32 %v642_v13, %v267_v48  ;;  %v271_v61 = vpop.permute.xlu1 %270  ;;  %358 = vrot.lane.b32.xlu2 %v1110_v47, %s591_s14  ;;  %v108_v13 = vld [vmem:[%s1562_s0 + $0x320] sm:$0xff] }
  0x80   :  { %v459_v63 = vmax.f32 %v644_v14, %v271_v61  ;;  %v110_v14 = vld [vmem:[%s1562_s0 + $0x330] sm:$0xff]  ;;  %v116_v48 = vld [vmem:[%s1562_s0 + $0x360] sm:$0xff]  ;;  %v117_v61 = vld [vmem:[%s1562_s0 + $0x368] sm:$0x3f] }
  0x81   :  { %523 = vst.msk [vmem:[%s1563_s1 + $0x8] sm:$0x3f] %vm522_vm1, %v457_v19  ;;  %v293_v7 = vpop.permute.xlu2 %292  ;;  %v1155_v28 = vmax.f32 %v108_v13, %v110_v14  ;;  %v1213_v14 = vmax.f32 %v116_v48, %v118_v52 }
  0x82   :  { %525 = vst.msk [vmem:[%s1563_s1 + $0x18] sm:$0x3f] %vm522_vm1, %v459_v63  ;;  %v470_v8 = vmax.f32 %v754_v46, %v293_v7  ;;  %v114_v46 = vld [vmem:[%s1562_s0 + $0x350] sm:$0xff] }
  0x83   :  { %v1175_v38 = vmax.f32 %v112_v24, %v114_v46  ;;  %v123_v24 = vld [vmem:[%s1562_s0 + $0x398] sm:$0x3f] }
  0x84   :  { %360 = vrot.lane.b32.xlu0 %v1123_v62, %s591_s14  ;;  %536 = vst.msk [vmem:[%s1563_s1 + $0x70] sm:$0xff] %vm520_vm0, %v470_v8 }
  0x85   :  { %362 = vrot.lane.b32.xlu1 %v1130_v1, %s591_s14 }
  0x86   :  { %v277_v21 = vpop.permute.xlu0 %276 }
  0x87   :  { %v462_v29 = vmax.f32 %v672_v22, %v277_v21  ;;  %v279_v3 = vpop.permute.xlu1 %278  ;;  %364 = vrot.lane.b32.xlu2 %v1155_v28, %s591_s14  ;;  %v113_v22 = vld [vmem:[%s1562_s0 + $0x348] sm:$0x3f] }
  0x88   :  { %v463_v36 = vmax.f32 %v674_v23, %v279_v3  ;;  %v115_v23 = vld [vmem:[%s1562_s0 + $0x358] sm:$0x3f]  ;;  %v121_v21 = vld [vmem:[%s1562_s0 + $0x388] sm:$0x3f]  ;;  %v124_v3 = vld [vmem:[%s1562_s0 + $0x3a0] sm:$0xff] }
  0x89   :  { %528 = vst.msk [vmem:[%s1563_s1 + $0x30] sm:$0xff] %vm520_vm0, %v462_v29  ;;  %v299_v42 = vpop.permute.xlu2 %298  ;;  %v1200_v37 = vmax.f32 %v113_v22, %v115_v23  ;;  %v1258_v23 = vmax.f32 %v121_v21, %v123_v24 }
  0x8a   :  { %529 = vst.msk [vmem:[%s1563_s1 + $0x38] sm:$0x3f] %vm522_vm1, %v463_v36  ;;  %v473_v43 = vmax.f32 %v784_v55, %v299_v42  ;;  %v119_v55 = vld [vmem:[%s1562_s0 + $0x378] sm:$0x3f] }
  0x8b   :  { %v1220_v8 = vmax.f32 %v117_v61, %v119_v55  ;;  %v130_v61 = vld [vmem:[%s1562_s0 + $0x3d0] sm:$0xff] }
  0x8c   :  { %366 = vrot.lane.b32.xlu0 %v1168_v5, %s591_s14  ;;  %539 = vst.msk [vmem:[%s1563_s1 + $0x88] sm:$0x3f] %vm522_vm1, %v473_v43 }
  0x8d   :  { %368 = vrot.lane.b32.xlu1 %v1175_v38, %s591_s14 }
  0x8e   :  { %v283_v19 = vpop.permute.xlu0 %282 }
  0x8f   :  { %v465_v63 = vmax.f32 %v702_v31, %v283_v19  ;;  %v285_v13 = vpop.permute.xlu1 %284  ;;  %370 = vrot.lane.b32.xlu2 %v1200_v37, %s591_s14  ;;  %v120_v31 = vld [vmem:[%s1562_s0 + $0x380] sm:$0xff] }
  0x90   :  { %v466_v7 = vmax.f32 %v704_v32, %v285_v13  ;;  %v122_v32 = vld [vmem:[%s1562_s0 + $0x390] sm:$0xff]  ;;  %v128_v19 = vld [vmem:[%s1562_s0 + $0x3c0] sm:$0xff]  ;;  %v129_v13 = vld [vmem:[%s1562_s0 + $0x3c8] sm:$0x3f] }
  0x91   :  { %531 = vst.msk [vmem:[%s1563_s1 + $0x48] sm:$0x3f] %vm522_vm1, %v465_v63  ;;  %v305_v16 = vpop.permute.xlu2 %304  ;;  %v1245_v46 = vmax.f32 %v120_v31, %v122_v32  ;;  %v1303_v32 = vmax.f32 %v128_v19, %v130_v61 }
  0x92   :  { %532 = vst.msk [vmem:[%s1563_s1 + $0x50] sm:$0xff] %vm520_vm0, %v466_v7  ;;  %v476_v20 = vmax.f32 %v814_v0, %v305_v16  ;;  %v126_v0 = vld [vmem:[%s1562_s0 + $0x3b0] sm:$0xff] }
  0x93   :  { %v1265_v43 = vmax.f32 %v124_v3, %v126_v0  ;;  %v135_v3 = vld [vmem:[%s1562_s0 + $0x3f8] sm:$0x3f] }
  0x94   :  { %372 = vrot.lane.b32.xlu0 %v1213_v14, %s591_s14  ;;  %542 = vst.msk [vmem:[%s1563_s1 + $0xa0] sm:$0xff] %vm520_vm0, %v476_v20 }
  0x95   :  { %374 = vrot.lane.b32.xlu1 %v1220_v8, %s591_s14 }
  0x96   :  { %v289_v29 = vpop.permute.xlu0 %288 }
  0x97   :  { %v468_v36 = vmax.f32 %v732_v40, %v289_v29  ;;  %v291_v22 = vpop.permute.xlu1 %290  ;;  %376 = vrot.lane.b32.xlu2 %v1245_v46, %s591_s14  ;;  %v125_v40 = vld [vmem:[%s1562_s0 + $0x3a8] sm:$0x3f] }
  0x98   :  { %v469_v42 = vmax.f32 %v734_v41, %v291_v22  ;;  %v127_v41 = vld [vmem:[%s1562_s0 + $0x3b8] sm:$0x3f]  ;;  %v133_v29 = vld [vmem:[%s1562_s0 + $0x3e8] sm:$0x3f] }
  0x99   :  { %534 = vst.msk [vmem:[%s1563_s1 + $0x60] sm:$0xff] %vm520_vm0, %v468_v36  ;;  %v311_v48 = vpop.permute.xlu2 %310  ;;  %v1290_v55 = vmax.f32 %v125_v40, %v127_v41 }
  0x9a   :  { %535 = vst.msk [vmem:[%s1563_s1 + $0x68] sm:$0x3f] %vm522_vm1, %v469_v42  ;;  %v479_v52 = vmax.f32 %v844_v11, %v311_v48  ;;  %v131_v11 = vld [vmem:[%s1562_s0 + $0x3d8] sm:$0x3f]  ;;  %v1342_v42 = vmax.f32 %v133_v29, %v135_v3 }
  0x9b   :  { %v1310_v20 = vmax.f32 %v129_v13, %v131_v11 }
  0x9c   :  { %378 = vrot.lane.b32.xlu0 %v1258_v23, %s591_s14  ;;  %545 = vst.msk [vmem:[%s1563_s1 + $0xb8] sm:$0x3f] %vm522_vm1, %v479_v52 }
  0x9d   :  { %380 = vrot.lane.b32.xlu1 %v1265_v43, %s591_s14 }
  0x9e   :  { %v295_v63 = vpop.permute.xlu0 %294 }
  0x9f   :  { %v471_v7 = vmax.f32 %v762_v49, %v295_v63  ;;  %v297_v31 = vpop.permute.xlu1 %296  ;;  %382 = vrot.lane.b32.xlu2 %v1290_v55, %s591_s14  ;;  %v132_v49 = vld [vmem:[%s1562_s0 + $0x3e0] sm:$0xff] }
  0xa0   :  { %v472_v16 = vmax.f32 %v764_v50, %v297_v31  ;;  %v134_v50 = vld [vmem:[%s1562_s0 + $0x3f0] sm:$0xff] }
  0xa1   :  { %537 = vst.msk [vmem:[%s1563_s1 + $0x78] sm:$0x3f] %vm522_vm1, %v471_v7  ;;  %v317_v21 = vpop.permute.xlu2 %316  ;;  %v1335_v0 = vmax.f32 %v132_v49, %v134_v50 }
  0xa2   :  { %538 = vst.msk [vmem:[%s1563_s1 + $0x80] sm:$0xff] %vm520_vm0, %v472_v16  ;;  %v482_v24 = vmax.f32 %v874_v26, %v317_v21 }
  0xa4   :  { %384 = vrot.lane.b32.xlu0 %v1303_v32, %s591_s14  ;;  %548 = vst.msk [vmem:[%s1563_s1 + $0xd0] sm:$0xff] %vm520_vm0, %v482_v24 }
  0xa5   :  { %386 = vrot.lane.b32.xlu1 %v1310_v20, %s591_s14 }
  0xa6   :  { %v301_v36 = vpop.permute.xlu0 %300 }
  0xa7   :  { %v474_v26 = vmax.f32 %v792_v58, %v301_v36  ;;  %v303_v22 = vpop.permute.xlu1 %302  ;;  %388 = vrot.lane.b32.xlu2 %v1335_v0, %s591_s14 }
  0xa8   :  { %v475_v40 = vmax.f32 %v794_v59, %v303_v22 }
  0xa9   :  { %540 = vst.msk [vmem:[%s1563_s1 + $0x90] sm:$0xff] %vm520_vm0, %v474_v26  ;;  %v323_v41 = vpop.permute.xlu2 %322 }
  0xaa   :  { %541 = vst.msk [vmem:[%s1563_s1 + $0x98] sm:$0x3f] %vm522_vm1, %v475_v40  ;;  %v485_v58 = vmax.f32 %v904_v39, %v323_v41 }
  0xac   :  { %390 = vrot.lane.b32.xlu0 %v1342_v42, %s591_s14  ;;  %551 = vst.msk [vmem:[%s1563_s1 + $0xe8] sm:$0x3f] %vm522_vm1, %v485_v58 }
  0xae   :  { %v307_v59 = vpop.permute.xlu0 %306 }
  0xaf   :  { %v477_v48 = vmax.f32 %v822_v4, %v307_v59  ;;  %v309_v52 = vpop.permute.xlu1 %308 }
  0xb0   :  { %v478_v19 = vmax.f32 %v824_v6, %v309_v52 }
  0xb1   :  { %543 = vst.msk [vmem:[%s1563_s1 + $0xa8] sm:$0x3f] %vm522_vm1, %v477_v48  ;;  %v329_v39 = vpop.permute.xlu2 %328 }
  0xb2   :  { %544 = vst.msk [vmem:[%s1563_s1 + $0xb0] sm:$0xff] %vm520_vm0, %v478_v19  ;;  %v488_v61 = vmax.f32 %v934_v53, %v329_v39 }
  0xb4   :  { %554 = vst.msk [vmem:[%s1563_s1 + $0x100] sm:$0xff] %vm520_vm0, %v488_v61 }
  0xb6   :  { %v313_v63 = vpop.permute.xlu0 %312 }
  0xb7   :  { %v480_v4 = vmax.f32 %v852_v17, %v313_v63  ;;  %v315_v6 = vpop.permute.xlu1 %314 }
  0xb8   :  { %v481_v13 = vmax.f32 %v854_v18, %v315_v6 }
  0xb9   :  { %546 = vst.msk [vmem:[%s1563_s1 + $0xc0] sm:$0xff] %vm520_vm0, %v480_v4  ;;  %v335_v53 = vpop.permute.xlu2 %334 }
  0xba   :  { %547 = vst.msk [vmem:[%s1563_s1 + $0xc8] sm:$0x3f] %vm522_vm1, %v481_v13  ;;  %v491_v11 = vmax.f32 %v964_v2, %v335_v53 }
  0xbc   :  { %557 = vst.msk [vmem:[%s1563_s1 + $0x118] sm:$0x3f] %vm522_vm1, %v491_v11 }
  0xbe   :  { %v319_v7 = vpop.permute.xlu0 %318 }
  0xbf   :  { %v483_v17 = vmax.f32 %v882_v30, %v319_v7  ;;  %v321_v18 = vpop.permute.xlu1 %320 }
  0xc0   :  { %v484_v31 = vmax.f32 %v884_v33, %v321_v18 }
  0xc1   :  { %549 = vst.msk [vmem:[%s1563_s1 + $0xd8] sm:$0x3f] %vm522_vm1, %v483_v17  ;;  %v341_v2 = vpop.permute.xlu2 %340 }
  0xc2   :  { %550 = vst.msk [vmem:[%s1563_s1 + $0xe0] sm:$0xff] %vm520_vm0, %v484_v31  ;;  %v494_v16 = vmax.f32 %v995_v27, %v341_v2 }
  0xc4   :  { %560 = vst.msk [vmem:[%s1563_s1 + $0x130] sm:$0xff] %vm520_vm0, %v494_v16 }
  0xc6   :  { %v325_v49 = vpop.permute.xlu0 %324 }
  0xc7   :  { %v486_v30 = vmax.f32 %v912_v44, %v325_v49  ;;  %v327_v33 = vpop.permute.xlu1 %326 }
  0xc8   :  { %v487_v50 = vmax.f32 %v914_v45, %v327_v33 }
  0xc9   :  { %552 = vst.msk [vmem:[%s1563_s1 + $0xf0] sm:$0xff] %vm520_vm0, %v486_v30  ;;  %v347_v27 = vpop.permute.xlu2 %346 }
  0xca   :  { %553 = vst.msk [vmem:[%s1563_s1 + $0xf8] sm:$0x3f] %vm522_vm1, %v487_v50  ;;  %v497_v21 = vmax.f32 %v1030_v51, %v347_v27 }
  0xcc   :  { %563 = vst.msk [vmem:[%s1563_s1 + $0x148] sm:$0x3f] %vm522_vm1, %v497_v21 }
  0xce   :  { %v331_v24 = vpop.permute.xlu0 %330 }
  0xcf   :  { %v489_v44 = vmax.f32 %v942_v57, %v331_v24  ;;  %v333_v45 = vpop.permute.xlu1 %332 }
  0xd0   :  { %v490_v29 = vmax.f32 %v944_v60, %v333_v45 }
  0xd1   :  { %555 = vst.msk [vmem:[%s1563_s1 + $0x108] sm:$0x3f] %vm522_vm1, %v489_v44  ;;  %v353_v51 = vpop.permute.xlu2 %352 }
  0xd2   :  { %556 = vst.msk [vmem:[%s1563_s1 + $0x110] sm:$0xff] %vm520_vm0, %v490_v29  ;;  %v500_v3 = vmax.f32 %v1065_v15, %v353_v51 }
  0xd4   :  { %566 = vst.msk [vmem:[%s1563_s1 + $0x160] sm:$0xff] %vm520_vm0, %v500_v3 }
  0xd6   :  { %v337_v36 = vpop.permute.xlu0 %336 }
  0xd7   :  { %v492_v57 = vmax.f32 %v972_v9, %v337_v36  ;;  %v339_v60 = vpop.permute.xlu1 %338 }
  0xd8   :  { %v493_v26 = vmax.f32 %v974_v10, %v339_v60 }
  0xd9   :  { %558 = vst.msk [vmem:[%s1563_s1 + $0x120] sm:$0xff] %vm520_vm0, %v492_v57  ;;  %v359_v15 = vpop.permute.xlu2 %358 }
  0xda   :  { %559 = vst.msk [vmem:[%s1563_s1 + $0x128] sm:$0x3f] %vm522_vm1, %v493_v26  ;;  %v503_v22 = vmax.f32 %v1110_v47, %v359_v15 }
  0xdc   :  { %569 = vst.msk [vmem:[%s1563_s1 + $0x178] sm:$0x3f] %vm522_vm1, %v503_v22 }
  0xde   :  { %v343_v40 = vpop.permute.xlu0 %342 }
  0xdf   :  { %v495_v9 = vmax.f32 %v1007_v34, %v343_v40  ;;  %v345_v10 = vpop.permute.xlu1 %344 }
  0xe0   :  { %v496_v41 = vmax.f32 %v1009_v35, %v345_v10 }
  0xe1   :  { %561 = vst.msk [vmem:[%s1563_s1 + $0x138] sm:$0x3f] %vm522_vm1, %v495_v9  ;;  %v365_v47 = vpop.permute.xlu2 %364 }
  0xe2   :  { %562 = vst.msk [vmem:[%s1563_s1 + $0x140] sm:$0xff] %vm520_vm0, %v496_v41  ;;  %v506_v58 = vmax.f32 %v1155_v28, %v365_v47 }
  0xe4   :  { %572 = vst.msk [vmem:[%s1563_s1 + $0x190] sm:$0xff] %vm520_vm0, %v506_v58 }
  0xe6   :  { %v349_v59 = vpop.permute.xlu0 %348 }
  0xe7   :  { %v498_v34 = vmax.f32 %v1042_v54, %v349_v59  ;;  %v351_v35 = vpop.permute.xlu1 %350 }
  0xe8   :  { %v499_v48 = vmax.f32 %v1044_v56, %v351_v35 }
  0xe9   :  { %564 = vst.msk [vmem:[%s1563_s1 + $0x150] sm:$0xff] %vm520_vm0, %v498_v34  ;;  %v371_v28 = vpop.permute.xlu2 %370 }
  0xea   :  { %565 = vst.msk [vmem:[%s1563_s1 + $0x158] sm:$0x3f] %vm522_vm1, %v499_v48  ;;  %v509_v52 = vmax.f32 %v1200_v37, %v371_v28 }
  0xec   :  { %575 = vst.msk [vmem:[%s1563_s1 + $0x1a8] sm:$0x3f] %vm522_vm1, %v509_v52 }
  0xee   :  { %v355_v19 = vpop.permute.xlu0 %354 }
  0xef   :  { %v501_v54 = vmax.f32 %v1078_v25, %v355_v19  ;;  %v357_v56 = vpop.permute.xlu1 %356 }
  0xf0   :  { %v502_v39 = vmax.f32 %v1085_v12, %v357_v56 }
  0xf1   :  { %567 = vst.msk [vmem:[%s1563_s1 + $0x168] sm:$0x3f] %vm522_vm1, %v501_v54  ;;  %v377_v37 = vpop.permute.xlu2 %376 }
  0xf2   :  { %568 = vst.msk [vmem:[%s1563_s1 + $0x170] sm:$0xff] %vm520_vm0, %v502_v39  ;;  %v512_v61 = vmax.f32 %v1245_v46, %v377_v37 }
  0xf4   :  { %578 = vst.msk [vmem:[%s1563_s1 + $0x1c0] sm:$0xff] %vm520_vm0, %v512_v61 }
  0xf6   :  { %v361_v63 = vpop.permute.xlu0 %360 }
  0xf7   :  { %v504_v25 = vmax.f32 %v1123_v62, %v361_v63  ;;  %v363_v12 = vpop.permute.xlu1 %362 }
  0xf8   :  { %v505_v4 = vmax.f32 %v1130_v1, %v363_v12 }
  0xf9   :  { %570 = vst.msk [vmem:[%s1563_s1 + $0x180] sm:$0xff] %vm520_vm0, %v504_v25  ;;  %v383_v46 = vpop.permute.xlu2 %382 }
  0xfa   :  { %571 = vst.msk [vmem:[%s1563_s1 + $0x188] sm:$0x3f] %vm522_vm1, %v505_v4  ;;  %v515_v6 = vmax.f32 %v1290_v55, %v383_v46 }
  0xfc   :  { %581 = vst.msk [vmem:[%s1563_s1 + $0x1d8] sm:$0x3f] %vm522_vm1, %v515_v6 }
  0xfe   :  { %v367_v13 = vpop.permute.xlu0 %366 }
  0xff   :  { %v507_v62 = vmax.f32 %v1168_v5, %v367_v13  ;;  %v369_v1 = vpop.permute.xlu1 %368 }
 0x100   :  { %v508_v53 = vmax.f32 %v1175_v38, %v369_v1 }
 0x101   :  { %573 = vst.msk [vmem:[%s1563_s1 + $0x198] sm:$0x3f] %vm522_vm1, %v507_v62  ;;  %v389_v55 = vpop.permute.xlu2 %388 }
 0x102   :  { %574 = vst.msk [vmem:[%s1563_s1 + $0x1a0] sm:$0xff] %vm520_vm0, %v508_v53  ;;  %v518_v11 = vmax.f32 %v1335_v0, %v389_v55 }
 0x104   :  { %584 = vst.msk [vmem:[%s1563_s1 + $0x1f0] sm:$0xff] %vm520_vm0, %v518_v11 }
 0x106   :  { %v373_v7 = vpop.permute.xlu0 %372 }
 0x107   :  { %v510_v5 = vmax.f32 %v1213_v14, %v373_v7  ;;  %v375_v38 = vpop.permute.xlu1 %374 }
 0x108   :  { %v511_v17 = vmax.f32 %v1220_v8, %v375_v38 }
 0x109   :  { %576 = vst.msk [vmem:[%s1563_s1 + $0x1b0] sm:$0xff] %vm520_vm0, %v510_v5 }
 0x10a   :  { %577 = vst.msk [vmem:[%s1563_s1 + $0x1b8] sm:$0x3f] %vm522_vm1, %v511_v17 }
 0x10e   :  { %v379_v0 = vpop.permute.xlu0 %378 }
 0x10f   :  { %v513_v18 = vmax.f32 %v1258_v23, %v379_v0  ;;  %v381_v31 = vpop.permute.xlu1 %380 }
 0x110   :  { %v514_v2 = vmax.f32 %v1265_v43, %v381_v31 }
 0x111   :  { %579 = vst.msk [vmem:[%s1563_s1 + $0x1c8] sm:$0x3f] %vm522_vm1, %v513_v18 }
 0x112   :  { %580 = vst.msk [vmem:[%s1563_s1 + $0x1d0] sm:$0xff] %vm520_vm0, %v514_v2 }
 0x116   :  { %v385_v14 = vpop.permute.xlu0 %384 }
 0x117   :  { %v516_v8 = vmax.f32 %v1303_v32, %v385_v14  ;;  %v387_v16 = vpop.permute.xlu1 %386 }
 0x118   :  { %v517_v49 = vmax.f32 %v1310_v20, %v387_v16 }
 0x119   :  { %582 = vst.msk [vmem:[%s1563_s1 + $0x1e0] sm:$0xff] %vm520_vm0, %v516_v8 }
 0x11a   :  { %583 = vst.msk [vmem:[%s1563_s1 + $0x1e8] sm:$0x3f] %vm522_vm1, %v517_v49 }
 0x11e   :  { %v391_v23 = vpop.permute.xlu0 %390 }
 0x11f   :  { %v519_v43 = vmax.f32 %v1342_v42, %v391_v23 }
 0x121   :  { %585 = vst.msk [vmem:[%s1563_s1 + $0x1f8] sm:$0x3f] %vm522_vm1, %v519_v43 }

// kernel: simple_cnn_forward.7
= control target key start
LH: loop header
LB: loop body
LE: loop exit
PB: predicated region body
PF: predicated region fallthrough
CT: control target
= control target key end

     0   :  { %s693_s12 = smov 0   ;;  %s791_s0 = inlined_call_operand.vmem [shape: f32[2,16,16,16], index: 0, kind: input, shape index: {}]   ;;  %s792_s1 = inlined_call_operand.vmem [shape: bf16[3,3,16,32], index: 1, kind: input, shape index: {}]   ;;  %s793_s2 = inlined_call_operand.vmem [shape: f32[1,32], index: 2, kind: input, shape index: {}]   ;;  %s794_s3 = inlined_call_operand.vmem [shape: f32[2,14,14,32], index: 3, kind: output, shape index: {}]  }
   0x1 LB: > { %s544_s13 = sadd.s32 4294967295, %s667_s12   ;;  %p548_p0 = scmp.ge.s32.totalorder %s667_s12, 1  ;;  %s667_s12 = sphi %s693_s12, %s13_s12  }
   0x2   : > { %p137_p1 = scmp.lt.s32.totalorder %s667_s12, 3 }
   0x4   : > { %p138_p2 = pnand %p548_p0, %p137_p1 }
   0x5   : > { %p161_p3 = scmp.lt.s32.totalorder (!%p138_p2), %s544_s13, 1  ;;  %s716_s24 = smov (!%p138_p2), 0  }
   0x6   : > { %141 = sbr.rel (%p138_p2) target bundleno = 195 (0xc3), region = 32 }
   0xb   : > { %v704_v0 = vld [vmem:[%s793_s2] sm:$0x1]  ;;  %s796_s13 = smov (!%p161_p3, %s544_s13), 1 }
   0xc   : > { %s630_s16 = sshll.u32 %s796_s13, 8  ;;  %s640_s17 = smul.u32 224, %s796_s13 }
   0xd   : > { %s709_s20 = scalar_lea.vmem %s791_s0, %s630_s16 }
   0xe   : > { %s714_s23 = scalar_lea.vmem %s794_s3, %s640_s17 }
   0xf LB: >> { %v632_v1 = vld [vmem:[%s792_s1 + $0x8] sm:$0xff]  ;;  %v631_v2 = vld [vmem:[%s792_s1] sm:$0xff]  ;;  %v633_v3 = vld [vmem:[%s792_s1 + $0x10] sm:$0xff]  ;;  %s552_s10 = sshll.u32 %s671_s24, 4  ;;  %vm198_vm0 = vcmask 130048   ;;  %v463_v62 = vperm.slane %v704_v0, 0  ;;  %s671_s24 = sphi %s716_s24, %s178_s24  }
  0x10   : >> { %v634_v4 = vld [vmem:[%s792_s1 + $0x18] sm:$0xff]  ;;  %v635_v5 = vld [vmem:[%s792_s1 + $0x20] sm:$0xff]  ;;  %v637_v6 = vld [vmem:[%s792_s1 + $0x30] sm:$0xff]  ;;  %209 = vmatpush.bf16.msra.mxu0 %v632_v1  ;;  %232 = vmatpush.bf16.msra.mxu1 %v631_v2  ;;  %s749_s16 = scalar_lea.vmem %s709_s20, %s552_s10  ;;  %s469_s19 = scalar_lea.vmem %s714_s23, %s552_s10  ;;  %vm470_vm1 = vcmask 261120   ;;  %vm472_vm2 = vcmask 259072  }
  0x11   : >> { %v638_v7 = vld [vmem:[%s792_s1 + $0x38] sm:$0xff]  ;;  %v636_v8 = vld [vmem:[%s792_s1 + $0x28] sm:$0xff]  ;;  %261 = vmatpush.bf16.msra.mxu2 %v633_v3  ;;  %295 = vmatpush.bf16.msra.mxu3 %v634_v4  ;;  %v639_v9 = vld [vmem:[%s792_s1 + $0x40] sm:$0xff]  ;;  %s178_s24 = sadd.s32 1, %s671_s24  }
  0x12   : >> { %v186_v10 = vld [vmem:[%s749_s16 + $0x1] sm:$0xff]  ;;  %v187_v11 = vld [vmem:[%s749_s16 + $0x9] sm:$0x3f]  ;;  %v573_v19 = vld [vmem:[%s749_s16 + $0x10] sm:$0xff]  ;;  %p175_p4 = scmp.ge.s32.totalorder %s178_s24, 14  }
  0x13   : >> { %v181_v12 = vld [vmem:[%s749_s16] sm:$0xff]  ;;  %v191_v13 = vpack.c.bf16 %v187_v11, %v186_v10  ;;  %v182_v14 = vld [vmem:[%s749_s16 + $0x8] sm:$0x3f]  ;;  %v574_v20 = vld [vmem:[%s749_s16 + $0x18] sm:$0x3f] }
  0x14   : >> { %326 = vmatpush.bf16.msrb.mxu0 %v635_v5  ;;  %v239_v15 = vld [vmem:[%s749_s16 + $0x2] sm:$0xff]  ;;  %v240_v16 = vld [vmem:[%s749_s16 + $0xa] sm:$0x3f]  ;;  %357 = vmatpush.bf16.msrb.mxu1 %v636_v8  ;;  %v185_v17 = vpack.c.bf16 %v182_v14, %v181_v12  ;;  %v278_v21 = vpack.c.bf16 %v574_v20, %v573_v19  ;;  %v582_v22 = vld [vmem:[%s749_s16 + $0x11] sm:$0xff] }
  0x15   : >> { %391 = vmatpush.bf16.msrb.mxu2 %v637_v6  ;;  %422 = vmatpush.bf16.msrb.mxu3 %v638_v7  ;;  %v244_v18 = vpack.c.bf16 %v240_v16, %v239_v15  ;;  %v583_v23 = vld [vmem:[%s749_s16 + $0x19] sm:$0x3f]  ;;  %v601_v24 = vld [vmem:[%s749_s16 + $0x20] sm:$0xff]  ;;  %v602_v25 = vld [vmem:[%s749_s16 + $0x28] sm:$0x3f] }
  0x16   : >> { %559 = vmatmul.msk.bf16.vlgmr.msra.gmra.mxu0 %vm198_vm0, %v191_v13  ;;  %564 = vmatmul.msk.bf16.vlgmr.msra.gmra.mxu1 %vm198_vm0, %v185_v17  ;;  %v591_v26 = vld [vmem:[%s749_s16 + $0x12] sm:$0xff]  ;;  %v592_v27 = vld [vmem:[%s749_s16 + $0x1a] sm:$0x3f]  ;;  %v610_v28 = vld [vmem:[%s749_s16 + $0x21] sm:$0xff]  ;;  %v309_v30 = vpack.c.bf16 %v583_v23, %v582_v22  ;;  %v374_v31 = vpack.c.bf16 %v602_v25, %v601_v24 }
  0x17   : >> { %571 = vmatmul.msk.bf16.vlgmr.msra.gmra.mxu2 %vm198_vm0, %v244_v18  ;;  %581 = vmatmul.msk.bf16.vlgmr.msra.gmra.mxu3 %vm198_vm0, %v278_v21  ;;  %v611_v29 = vld [vmem:[%s749_s16 + $0x29] sm:$0x3f]  ;;  %v340_v32 = vpack.c.bf16 %v592_v27, %v591_v26 }
  0x18   : >> { %453 = vmatpush.bf16.msra.mxu0 %v639_v9  ;;  %v405_v33 = vpack.c.bf16 %v611_v29, %v610_v28  ;;  %v619_v34 = vld [vmem:[%s749_s16 + $0x22] sm:$0xff]  ;;  %v620_v35 = vld [vmem:[%s749_s16 + $0x2a] sm:$0x3f] }
  0x19   : >> { %v436_v36 = vpack.c.bf16 %v620_v35, %v619_v34 }
  0x26   : >> { %590 = vmatmul.msk.bf16.vlgmr.msrb.gmra.mxu0 %vm198_vm0, %v309_v30  ;;  %599 = vmatmul.msk.bf16.vlgmr.msrb.gmra.mxu1 %vm198_vm0, %v340_v32 }
  0x27   : >> { %609 = vmatmul.msk.bf16.vlgmr.msrb.gmra.mxu2 %vm198_vm0, %v374_v31  ;;  %618 = vmatmul.msk.bf16.vlgmr.msrb.gmra.mxu3 %vm198_vm0, %v405_v33 }
  0x36   : >> { %627 = vmatmul.msk.bf16.vlgmr.msra.gmra.mxu0 %vm198_vm0, %v436_v36 }
  0x93   : >> { %v211_v37 = vpop.f32.mrf.mxu0  ;;  %v234_v38 = vpop.f32.mrf.mxu1 }
  0x94   : >> { %v235_v43 = vadd.f32 %v234_v38, %v211_v37 }
  0x9a   : >> { %v263_v39 = vpop.f32.mrf.mxu2  ;;  %v297_v40 = vpop.f32.mrf.mxu3 }
  0x9b   : >> { %v213_v41 = vpop.f32.mrf.mxu0  ;;  %v236_v42 = vpop.f32.mrf.mxu1  ;;  %v268_v44 = vadd.f32 %v263_v39, %v235_v43 }
  0x9c   : >> { %v237_v50 = vadd.f32 %v236_v42, %v213_v41 }
  0x9d   : >> { %v302_v48 = vadd.f32 %v297_v40, %v268_v44 }
  0xa2   : >> { %v265_v45 = vpop.f32.mrf.mxu2  ;;  %v299_v47 = vpop.f32.mrf.mxu3 }
  0xa3   : >> { %v328_v46 = vpop.f32.mrf.mxu0  ;;  %v359_v49 = vpop.f32.mrf.mxu1  ;;  %v269_v52 = vadd.f32 %v265_v45, %v237_v50 }
  0xa4   : >> { %v333_v51 = vadd.f32 %v328_v46, %v302_v48 }
  0xa5   : >> { %v303_v56 = vadd.f32 %v299_v47, %v269_v52 }
  0xa6   : >> { %v364_v55 = vadd.f32 %v359_v49, %v333_v51 }
  0xaa   : >> { %v393_v53 = vpop.f32.mrf.mxu2  ;;  %v424_v58 = vpop.f32.mrf.mxu3 }
  0xab   : >> { %v330_v54 = vpop.f32.mrf.mxu0  ;;  %v398_v57 = vadd.f32 %v393_v53, %v364_v55  ;;  %v361_v60 = vpop.f32.mrf.mxu1 }
  0xac   : >> { %v334_v59 = vadd.f32 %v330_v54, %v303_v56 }
  0xad   : >> { %v429_v61 = vadd.f32 %v424_v58, %v398_v57 }
  0xae   : >> { %v365_v2 = vadd.f32 %v361_v60, %v334_v59 }
  0xb2   : >> { %v395_v63 = vpop.f32.mrf.mxu2  ;;  %v426_v7 = vpop.f32.mrf.mxu3 }
  0xb3   : >> { %v455_v1 = vpop.f32.mrf.mxu0  ;;  %v399_v4 = vadd.f32 %v395_v63, %v365_v2 }
  0xb4   : >> { %v460_v3 = vadd.f32 %v455_v1, %v429_v61 }
  0xb5   : >> { %v430_v8 = vadd.f32 %v426_v7, %v399_v4 }
  0xb6   : >> { %v465_v5 = vadd.f32 %v463_v62, %v460_v3 }
  0xb8   : >> { %v467_v6 = vmax.f32 %v465_v5, 0.0 }
  0xba   : >> { %471 = vst.msk [vmem:[%s469_s19] sm:$0xff] %vm470_vm1, %v467_v6 }
  0xbb   : >> { %v457_v9 = vpop.f32.mrf.mxu0 }
  0xbc   : >> { %v461_v10 = vadd.f32 %v457_v9, %v430_v8 }
  0xbe   : >> { %v466_v11 = vadd.f32 %v463_v62, %v461_v10  ;;  %177 = sbr.rel (!%p175_p4) target bundleno = 15 (0xf), region = 81 }
  0xc0   : >> { %v468_v12 = vmax.f32 %v466_v11, 0.0 }
  0xc2   : >> { %473 = vst.msk [vmem:[%s469_s19 + $0x8] sm:$0x3f] %vm472_vm2, %v468_v12 }
  0xc3 PF: > { %s13_s12 = sadd.s32 1, %s667_s12  }
  0xc4   : > { %p10_p5 = scmp.ge.s32.totalorder %s13_s12, 4  }
  0xc6   :  { %12 = sbr.rel (!%p10_p5) target bundleno = 1 (0x1), region = 92 }

// kernel: simple_cnn_forward.8
= control target key start
LH: loop header
LB: loop body
LE: loop exit
PB: predicated region body
PF: predicated region fallthrough
CT: control target
= control target key end

     0   :  { %s158_s14 = smov 96   ;;  %vm136_vm0 = vcmask 260096   ;;  %s377_s0 = inlined_call_operand.vmem [shape: f32[16,2,7,64], index: 0, kind: input, shape index: {}]   ;;  %s378_s1 = inlined_call_operand.vmem [shape: f32[16,7,32], index: 1, kind: output, shape index: {}]  }
   0x1   :  { %v8_v0 = vld [vmem:[%s377_s0] sm:$0x7f]  ;;  %v9_v1 = vld [vmem:[%s377_s0 + $0x8] sm:$0x7f]  ;;  %v10_v6 = vld [vmem:[%s377_s0 + $0x10] sm:$0x7f] }
   0x2   :  { %v12_v2 = vld [vmem:[%s377_s0 + $0x20] sm:$0x7f]  ;;  %v178_v3 = vmax.f32 %v8_v0, %v9_v1  ;;  %v13_v4 = vld [vmem:[%s377_s0 + $0x28] sm:$0x7f]  ;;  %v11_v7 = vld [vmem:[%s377_s0 + $0x18] sm:$0x7f] }
   0x3   :  { %v183_v5 = vmax.f32 %v12_v2, %v13_v4  ;;  %v16_v8 = vld [vmem:[%s377_s0 + $0x40] sm:$0x7f]  ;;  %v14_v9 = vld [vmem:[%s377_s0 + $0x30] sm:$0x7f]  ;;  %v15_v10 = vld [vmem:[%s377_s0 + $0x38] sm:$0x7f]  ;;  %v207_v13 = vmax.f32 %v10_v6, %v11_v7 }
   0x4   :  { %72 = vrot.lane.b32.xlu0 %v178_v3, %s158_s14  ;;  %v17_v11 = vld [vmem:[%s377_s0 + $0x48] sm:$0x7f]  ;;  %v209_v14 = vmax.f32 %v14_v9, %v15_v10  ;;  %v18_v15 = vld [vmem:[%s377_s0 + $0x50] sm:$0x7f]  ;;  %v19_v16 = vld [vmem:[%s377_s0 + $0x58] sm:$0x7f] }
   0x5   :  { %76 = vrot.lane.b32.xlu1 %v183_v5, %s158_s14  ;;  %v44_v12 = vmax.f32 %v16_v8, %v17_v11  ;;  %v20_v17 = vld [vmem:[%s377_s0 + $0x60] sm:$0x7f]  ;;  %v21_v18 = vld [vmem:[%s377_s0 + $0x68] sm:$0x7f]  ;;  %v45_v19 = vmax.f32 %v18_v15, %v19_v16  ;;  %v22_v20 = vld [vmem:[%s377_s0 + $0x70] sm:$0x7f] }
   0x6   :  { %v23_v21 = vld [vmem:[%s377_s0 + $0x78] sm:$0x7f]  ;;  %v234_v22 = vmax.f32 %v20_v17, %v21_v18  ;;  %v24_v24 = vld [vmem:[%s377_s0 + $0x80] sm:$0x7f]  ;;  %v25_v25 = vld [vmem:[%s377_s0 + $0x88] sm:$0x7f] }
   0x7   :  { %80 = vrot.lane.b32.xlu2 %v44_v12, %s158_s14  ;;  %v236_v23 = vmax.f32 %v22_v20, %v23_v21  ;;  %v26_v26 = vld [vmem:[%s377_s0 + $0x90] sm:$0x7f]  ;;  %v27_v27 = vld [vmem:[%s377_s0 + $0x98] sm:$0x7f]  ;;  %v48_v28 = vmax.f32 %v24_v24, %v25_v25  ;;  %v28_v29 = vld [vmem:[%s377_s0 + $0xa0] sm:$0x7f] }
   0x8   :  { %v29_v30 = vld [vmem:[%s377_s0 + $0xa8] sm:$0x7f]  ;;  %v261_v31 = vmax.f32 %v26_v26, %v27_v27  ;;  %v30_v33 = vld [vmem:[%s377_s0 + $0xb0] sm:$0x7f]  ;;  %v31_v34 = vld [vmem:[%s377_s0 + $0xb8] sm:$0x7f] }
   0x9   :  { %v263_v32 = vmax.f32 %v28_v29, %v29_v30  ;;  %v32_v35 = vld [vmem:[%s377_s0 + $0xc0] sm:$0x7f]  ;;  %v33_v36 = vld [vmem:[%s377_s0 + $0xc8] sm:$0x7f]  ;;  %v51_v37 = vmax.f32 %v30_v33, %v31_v34  ;;  %v34_v38 = vld [vmem:[%s377_s0 + $0xd0] sm:$0x7f] }
   0xa   :  { %v35_v39 = vld [vmem:[%s377_s0 + $0xd8] sm:$0x7f]  ;;  %v52_v40 = vmax.f32 %v32_v35, %v33_v36  ;;  %v36_v42 = vld [vmem:[%s377_s0 + $0xe0] sm:$0x7f]  ;;  %v37_v43 = vld [vmem:[%s377_s0 + $0xe8] sm:$0x7f] }
   0xb   :  { %v53_v41 = vmax.f32 %v34_v38, %v35_v39  ;;  %v38_v44 = vld [vmem:[%s377_s0 + $0xf0] sm:$0x7f]  ;;  %v39_v45 = vld [vmem:[%s377_s0 + $0xf8] sm:$0x7f]  ;;  %v54_v46 = vmax.f32 %v36_v42, %v37_v43 }
   0xc   :  { %74 = vrot.lane.b32.xlu0 %v207_v13, %s158_s14  ;;  %v55_v47 = vmax.f32 %v38_v44, %v39_v45 }
   0xd   :  { %78 = vrot.lane.b32.xlu1 %v209_v14, %s158_s14 }
   0xf   :  { %82 = vrot.lane.b32.xlu2 %v45_v19, %s158_s14 }
  0x14   :  { %84 = vrot.lane.b32.xlu0 %v234_v22, %s158_s14 }
  0x15   :  { %86 = vrot.lane.b32.xlu1 %v236_v23, %s158_s14 }
  0x17   :  { %88 = vrot.lane.b32.xlu2 %v48_v28, %s158_s14 }
  0x1c   :  { %90 = vrot.lane.b32.xlu0 %v261_v31, %s158_s14 }
  0x1d   :  { %92 = vrot.lane.b32.xlu1 %v263_v32, %s158_s14 }
  0x1f   :  { %94 = vrot.lane.b32.xlu2 %v51_v37, %s158_s14 }
  0x24   :  { %96 = vrot.lane.b32.xlu0 %v52_v40, %s158_s14 }
  0x25   :  { %98 = vrot.lane.b32.xlu1 %v53_v41, %s158_s14 }
  0x27   :  { %100 = vrot.lane.b32.xlu2 %v54_v46, %s158_s14 }
  0x2c   :  { %102 = vrot.lane.b32.xlu0 %v55_v47, %s158_s14 }
  0x61   :  { %v81_v48 = vpop.permute.xlu2 %80 }
  0x62   :  { %v124_v49 = vmax.f32 %v44_v12, %v81_v48 }
  0x64   :  { %141 = vst.msk [vmem:[%s378_s1 + $0x20] sm:$0x7f] %vm136_vm0, %v124_v49 }
  0x69   :  { %v83_v50 = vpop.permute.xlu2 %82 }
  0x6a   :  { %v125_v51 = vmax.f32 %v45_v19, %v83_v50 }
  0x6c   :  { %142 = vst.msk [vmem:[%s378_s1 + $0x28] sm:$0x7f] %vm136_vm0, %v125_v51 }
  0x71   :  { %v89_v52 = vpop.permute.xlu2 %88 }
  0x72   :  { %v128_v53 = vmax.f32 %v48_v28, %v89_v52 }
  0x74   :  { %145 = vst.msk [vmem:[%s378_s1 + $0x40] sm:$0x7f] %vm136_vm0, %v128_v53 }
  0x76   :  { %v73_v54 = vpop.permute.xlu0 %72 }
  0x77   :  { %v120_v55 = vmax.f32 %v178_v3, %v73_v54  ;;  %v77_v56 = vpop.permute.xlu1 %76 }
  0x78   :  { %v122_v57 = vmax.f32 %v183_v5, %v77_v56 }
  0x79   :  { %137 = vst.msk [vmem:[%s378_s1] sm:$0x7f] %vm136_vm0, %v120_v55  ;;  %v95_v58 = vpop.permute.xlu2 %94 }
  0x7a   :  { %139 = vst.msk [vmem:[%s378_s1 + $0x10] sm:$0x7f] %vm136_vm0, %v122_v57  ;;  %v131_v59 = vmax.f32 %v51_v37, %v95_v58 }
  0x7c   :  { %148 = vst.msk [vmem:[%s378_s1 + $0x58] sm:$0x7f] %vm136_vm0, %v131_v59 }
  0x7e   :  { %v75_v60 = vpop.permute.xlu0 %74 }
  0x7f   :  { %v121_v61 = vmax.f32 %v207_v13, %v75_v60  ;;  %v79_v62 = vpop.permute.xlu1 %78 }
  0x80   :  { %v123_v63 = vmax.f32 %v209_v14, %v79_v62 }
  0x81   :  { %138 = vst.msk [vmem:[%s378_s1 + $0x8] sm:$0x7f] %vm136_vm0, %v121_v61  ;;  %v101_v0 = vpop.permute.xlu2 %100 }
  0x82   :  { %140 = vst.msk [vmem:[%s378_s1 + $0x18] sm:$0x7f] %vm136_vm0, %v123_v63  ;;  %v134_v1 = vmax.f32 %v54_v46, %v101_v0 }
  0x84   :  { %151 = vst.msk [vmem:[%s378_s1 + $0x70] sm:$0x7f] %vm136_vm0, %v134_v1 }
  0x86   :  { %v85_v2 = vpop.permute.xlu0 %84 }
  0x87   :  { %v126_v3 = vmax.f32 %v234_v22, %v85_v2  ;;  %v87_v4 = vpop.permute.xlu1 %86 }
  0x88   :  { %v127_v5 = vmax.f32 %v236_v23, %v87_v4 }
  0x89   :  { %143 = vst.msk [vmem:[%s378_s1 + $0x30] sm:$0x7f] %vm136_vm0, %v126_v3 }
  0x8a   :  { %144 = vst.msk [vmem:[%s378_s1 + $0x38] sm:$0x7f] %vm136_vm0, %v127_v5 }
  0x8e   :  { %v91_v6 = vpop.permute.xlu0 %90 }
  0x8f   :  { %v129_v7 = vmax.f32 %v261_v31, %v91_v6  ;;  %v93_v8 = vpop.permute.xlu1 %92 }
  0x90   :  { %v130_v9 = vmax.f32 %v263_v32, %v93_v8 }
  0x91   :  { %146 = vst.msk [vmem:[%s378_s1 + $0x48] sm:$0x7f] %vm136_vm0, %v129_v7 }
  0x92   :  { %147 = vst.msk [vmem:[%s378_s1 + $0x50] sm:$0x7f] %vm136_vm0, %v130_v9 }
  0x96   :  { %v97_v10 = vpop.permute.xlu0 %96 }
  0x97   :  { %v132_v11 = vmax.f32 %v52_v40, %v97_v10  ;;  %v99_v12 = vpop.permute.xlu1 %98 }
  0x98   :  { %v133_v13 = vmax.f32 %v53_v41, %v99_v12 }
  0x99   :  { %149 = vst.msk [vmem:[%s378_s1 + $0x60] sm:$0x7f] %vm136_vm0, %v132_v11 }
  0x9a   :  { %150 = vst.msk [vmem:[%s378_s1 + $0x68] sm:$0x7f] %vm136_vm0, %v133_v13 }
  0x9e   :  { %v103_v14 = vpop.permute.xlu0 %102 }
  0x9f   :  { %v135_v15 = vmax.f32 %v55_v47, %v103_v14 }
  0xa1   :  { %152 = vst.msk [vmem:[%s378_s1 + $0x78] sm:$0x7f] %vm136_vm0, %v135_v15 }

// kernel: simple_cnn_forward.9
= control target key start
LH: loop header
LB: loop body
LE: loop exit
PB: predicated region body
PF: predicated region fallthrough
CT: control target
= control target key end

     0   :  { %vm835_vm0 = vcmask 261120   ;;  %vm1091_vm1 = vcmask 80896   ;;  %s2026_s1 = inlined_call_operand.vmem [shape: bf16[1568,128], index: 1, kind: input, shape index: {}]   ;;  %s2027_s2 = inlined_call_operand.vmem [shape: f32[1,128], index: 2, kind: input, shape index: {}]   ;;  %s2028_s0 = inlined_call_operand.vmem [shape: f32[8,1568], index: 0, kind: input, shape index: {}]   ;;  %s2029_s4 = inlined_call_operand.vmem [shape: f32[1,10], index: 4, kind: input, shape index: {}]   ;;  %s2030_s3 = inlined_call_operand.vmem [shape: bf16[128,10], index: 3, kind: input, shape index: {}]   ;;  %s2031_s5 = inlined_call_operand.vmem [shape: f32[8,10], index: 5, kind: output, shape index: {}]  }
   0x1   :  { %v1529_v0 = vld [vmem:[%s2026_s1 + $0x38] sm:$0xff]  ;;  %v1528_v4 = vld [vmem:[%s2026_s1 + $0x30] sm:$0xff]  ;;  %v1527_v8 = vld [vmem:[%s2026_s1 + $0x28] sm:$0xff] }
   0x2   :  { %v1545_v1 = vld [vmem:[%s2026_s1 + $0xb8] sm:$0xff]  ;;  %839 = vmatpush.bf16.msra.mxu0 %v1529_v0  ;;  %v1544_v5 = vld [vmem:[%s2026_s1 + $0xb0] sm:$0xff]  ;;  %v1543_v9 = vld [vmem:[%s2026_s1 + $0xa8] sm:$0xff] }
   0x3   :  { %v1553_v2 = vld [vmem:[%s2026_s1 + $0xf8] sm:$0xff]  ;;  %865 = vmatpush.bf16.msra.mxu2 %v1545_v1  ;;  %v1552_v6 = vld [vmem:[%s2026_s1 + $0xf0] sm:$0xff]  ;;  %v1551_v10 = vld [vmem:[%s2026_s1 + $0xe8] sm:$0xff] }
   0x4   :  { %v1537_v3 = vld [vmem:[%s2026_s1 + $0x78] sm:$0xff]  ;;  %878 = vmatpush.bf16.msra.mxu3 %v1553_v2  ;;  %v1536_v7 = vld [vmem:[%s2026_s1 + $0x70] sm:$0xff]  ;;  %v1535_v11 = vld [vmem:[%s2026_s1 + $0x68] sm:$0xff] }
   0x5   :  { %852 = vmatpush.bf16.msra.mxu1 %v1537_v3  ;;  %v1526_v12 = vld [vmem:[%s2026_s1 + $0x20] sm:$0xff]  ;;  %v1525_v16 = vld [vmem:[%s2026_s1 + $0x18] sm:$0xff]  ;;  %v1524_v20 = vld [vmem:[%s2026_s1 + $0x10] sm:$0xff] }
   0x6   :  { %840 = vmatpush.bf16.msra.mxu0 %v1528_v4  ;;  %v1542_v13 = vld [vmem:[%s2026_s1 + $0xa0] sm:$0xff]  ;;  %v1541_v17 = vld [vmem:[%s2026_s1 + $0x98] sm:$0xff]  ;;  %v1540_v21 = vld [vmem:[%s2026_s1 + $0x90] sm:$0xff] }
   0x7   :  { %866 = vmatpush.bf16.msra.mxu2 %v1544_v5  ;;  %v1550_v14 = vld [vmem:[%s2026_s1 + $0xe0] sm:$0xff]  ;;  %v1549_v18 = vld [vmem:[%s2026_s1 + $0xd8] sm:$0xff]  ;;  %v1548_v22 = vld [vmem:[%s2026_s1 + $0xd0] sm:$0xff] }
   0x8   :  { %879 = vmatpush.bf16.msra.mxu3 %v1552_v6  ;;  %v1534_v15 = vld [vmem:[%s2026_s1 + $0x60] sm:$0xff]  ;;  %v1533_v19 = vld [vmem:[%s2026_s1 + $0x58] sm:$0xff]  ;;  %v1532_v23 = vld [vmem:[%s2026_s1 + $0x50] sm:$0xff] }
   0x9   :  { %853 = vmatpush.bf16.msra.mxu1 %v1536_v7  ;;  %v1523_v24 = vld [vmem:[%s2026_s1 + $0x8] sm:$0xff]  ;;  %v1522_v28 = vld [vmem:[%s2026_s1] sm:$0xff]  ;;  %v23_v30 = vld [vmem:[%s2028_s0 + $0x10] sm:$0xff] }
   0xa   :  { %841 = vmatpush.bf16.msra.mxu0 %v1527_v8  ;;  %v1539_v25 = vld [vmem:[%s2026_s1 + $0x88] sm:$0xff]  ;;  %v1538_v29 = vld [vmem:[%s2026_s1 + $0x80] sm:$0xff]  ;;  %v1561_v32 = vld [vmem:[%s2026_s1 + $0x138] sm:$0xff]  ;;  %v36_v38 = vpack.c.bf16 %v23_v30, %v23_v30 }
   0xb   :  { %867 = vmatpush.bf16.msra.mxu2 %v1543_v9  ;;  %v1547_v26 = vld [vmem:[%s2026_s1 + $0xc8] sm:$0xff]  ;;  %v1546_v31 = vld [vmem:[%s2026_s1 + $0xc0] sm:$0xff]  ;;  %v1577_v34 = vld [vmem:[%s2026_s1 + $0x1b8] sm:$0xff] }
   0xc   :  { %880 = vmatpush.bf16.msra.mxu3 %v1551_v10  ;;  %v1531_v27 = vld [vmem:[%s2026_s1 + $0x48] sm:$0xff]  ;;  %v21_v33 = vld [vmem:[%s2028_s0] sm:$0xff]  ;;  %v1585_v35 = vld [vmem:[%s2026_s1 + $0x1f8] sm:$0xff] }
   0xd   :  { %854 = vmatpush.bf16.msra.mxu1 %v1535_v11  ;;  %v24_v36 = vld [vmem:[%s2028_s0 + $0x18] sm:$0xff]  ;;  %v1530_v37 = vld [vmem:[%s2026_s1 + $0x40] sm:$0xff]  ;;  %v34_v40 = vpack.c.bf16 %v21_v33, %v21_v33  ;;  %v22_v41 = vld [vmem:[%s2028_s0 + $0x8] sm:$0xff] }
   0xe   :  { %842 = vmatpush.bf16.msra.mxu0 %v1526_v12  ;;  %v1569_v39 = vld [vmem:[%s2026_s1 + $0x178] sm:$0xff]  ;;  %v1560_v42 = vld [vmem:[%s2026_s1 + $0x130] sm:$0xff]  ;;  %v37_v43 = vpack.c.bf16 %v24_v36, %v24_v36  ;;  %v35_v46 = vpack.c.bf16 %v22_v41, %v22_v41  ;;  %v1559_v48 = vld [vmem:[%s2026_s1 + $0x128] sm:$0xff] }
   0xf   :  { %868 = vmatpush.bf16.msra.mxu2 %v1542_v13  ;;  %v1576_v44 = vld [vmem:[%s2026_s1 + $0x1b0] sm:$0xff]  ;;  %v1575_v49 = vld [vmem:[%s2026_s1 + $0x1a8] sm:$0xff]  ;;  %v1558_v52 = vld [vmem:[%s2026_s1 + $0x120] sm:$0xff] }
  0x10   :  { %881 = vmatpush.bf16.msra.mxu3 %v1550_v14  ;;  %v1584_v45 = vld [vmem:[%s2026_s1 + $0x1f0] sm:$0xff]  ;;  %v1583_v50 = vld [vmem:[%s2026_s1 + $0x1e8] sm:$0xff]  ;;  %v1574_v53 = vld [vmem:[%s2026_s1 + $0x1a0] sm:$0xff] }
  0x11   :  { %855 = vmatpush.bf16.msra.mxu1 %v1534_v15  ;;  %v1568_v47 = vld [vmem:[%s2026_s1 + $0x170] sm:$0xff]  ;;  %v1567_v51 = vld [vmem:[%s2026_s1 + $0x168] sm:$0xff]  ;;  %v1582_v54 = vld [vmem:[%s2026_s1 + $0x1e0] sm:$0xff] }
  0x12   :  { %843 = vmatpush.bf16.msra.mxu0 %v1525_v16  ;;  %v1566_v55 = vld [vmem:[%s2026_s1 + $0x160] sm:$0xff]  ;;  %v1557_v56 = vld [vmem:[%s2026_s1 + $0x118] sm:$0xff]  ;;  %v1556_v60 = vld [vmem:[%s2026_s1 + $0x110] sm:$0xff] }
  0x13   :  { %869 = vmatpush.bf16.msra.mxu2 %v1541_v17  ;;  %v1573_v57 = vld [vmem:[%s2026_s1 + $0x198] sm:$0xff]  ;;  %v1572_v61 = vld [vmem:[%s2026_s1 + $0x190] sm:$0xff]  ;;  %v1555_v0 = vld [vmem:[%s2026_s1 + $0x108] sm:$0xff] }
  0x14   :  { %882 = vmatpush.bf16.msra.mxu3 %v1549_v18  ;;  %v1581_v58 = vld [vmem:[%s2026_s1 + $0x1d8] sm:$0xff]  ;;  %v1580_v62 = vld [vmem:[%s2026_s1 + $0x1d0] sm:$0xff]  ;;  %v1571_v1 = vld [vmem:[%s2026_s1 + $0x188] sm:$0xff] }
  0x15   :  { %856 = vmatpush.bf16.msra.mxu1 %v1533_v19  ;;  %v1565_v59 = vld [vmem:[%s2026_s1 + $0x158] sm:$0xff]  ;;  %v1564_v63 = vld [vmem:[%s2026_s1 + $0x150] sm:$0xff]  ;;  %v1579_v2 = vld [vmem:[%s2026_s1 + $0x1c8] sm:$0xff] }
  0x16   :  { %844 = vmatpush.bf16.msra.mxu0 %v1524_v20  ;;  %v1563_v3 = vld [vmem:[%s2026_s1 + $0x148] sm:$0xff]  ;;  %v1554_v4 = vld [vmem:[%s2026_s1 + $0x100] sm:$0xff]  ;;  %v1593_v7 = vld [vmem:[%s2026_s1 + $0x238] sm:$0xff] }
  0x17   :  { %870 = vmatpush.bf16.msra.mxu2 %v1540_v21  ;;  %v1570_v5 = vld [vmem:[%s2026_s1 + $0x180] sm:$0xff]  ;;  %v27_v8 = vld [vmem:[%s2028_s0 + $0x30] sm:$0xff]  ;;  %v1609_v9 = vld [vmem:[%s2026_s1 + $0x2b8] sm:$0xff] }
  0x18   :  { %883 = vmatpush.bf16.msra.mxu3 %v1548_v22  ;;  %v1578_v6 = vld [vmem:[%s2026_s1 + $0x1c0] sm:$0xff]  ;;  %v28_v11 = vld [vmem:[%s2028_s0 + $0x38] sm:$0xff]  ;;  %v40_v15 = vpack.c.bf16 %v27_v8, %v27_v8  ;;  %v26_v16 = vld [vmem:[%s2028_s0 + $0x28] sm:$0xff] }
  0x19   :  { %857 = vmatpush.bf16.msra.mxu1 %v1532_v23  ;;  %v25_v10 = vld [vmem:[%s2028_s0 + $0x20] sm:$0xff]  ;;  %v1617_v12 = vld [vmem:[%s2026_s1 + $0x2f8] sm:$0xff]  ;;  %v41_v18 = vpack.c.bf16 %v28_v11, %v28_v11  ;;  %v1592_v19 = vld [vmem:[%s2026_s1 + $0x230] sm:$0xff]  ;;  %v39_v22 = vpack.c.bf16 %v26_v16, %v26_v16 }
  0x1a   :  { %845 = vmatpush.bf16.msra.mxu0 %v1523_v24  ;;  %v1562_v13 = vld [vmem:[%s2026_s1 + $0x140] sm:$0xff]  ;;  %v1601_v14 = vld [vmem:[%s2026_s1 + $0x278] sm:$0xff]  ;;  %v38_v17 = vpack.c.bf16 %v25_v10, %v25_v10  ;;  %v1608_v20 = vld [vmem:[%s2026_s1 + $0x2b0] sm:$0xff] }
  0x1b   :  { %871 = vmatpush.bf16.msra.mxu2 %v1539_v25  ;;  %v1616_v21 = vld [vmem:[%s2026_s1 + $0x2f0] sm:$0xff]  ;;  %v1591_v24 = vld [vmem:[%s2026_s1 + $0x228] sm:$0xff]  ;;  %v1614_v30 = vld [vmem:[%s2026_s1 + $0x2e0] sm:$0xff] }
  0x1c   :  { %884 = vmatpush.bf16.msra.mxu3 %v1547_v26  ;;  %v1600_v23 = vld [vmem:[%s2026_s1 + $0x270] sm:$0xff]  ;;  %v1607_v25 = vld [vmem:[%s2026_s1 + $0x2a8] sm:$0xff]  ;;  %v1605_v33 = vld [vmem:[%s2026_s1 + $0x298] sm:$0xff] }
  0x1d   :  { %858 = vmatpush.bf16.msra.mxu1 %v1531_v27  ;;  %v1615_v26 = vld [vmem:[%s2026_s1 + $0x2e8] sm:$0xff]  ;;  %v1588_v36 = vld [vmem:[%s2026_s1 + $0x210] sm:$0xff]  ;;  %v1624_v8 = vld [vmem:[%s2030_s3 + $0x20] sm:$0xff] }
  0x1e   :  { %846 = vmatpush.bf16.msra.mxu0 %v1522_v28  ;;  %v1599_v27 = vld [vmem:[%s2026_s1 + $0x268] sm:$0xff]  ;;  %v1590_v28 = vld [vmem:[%s2026_s1 + $0x220] sm:$0xff] }
  0x1f   :  { %872 = vmatpush.bf16.msra.mxu2 %v1538_v29  ;;  %v1606_v29 = vld [vmem:[%s2026_s1 + $0x2a0] sm:$0xff]  ;;  %v1603_v41 = vld [vmem:[%s2026_s1 + $0x288] sm:$0xff] }
  0x20   :  { %885 = vmatpush.bf16.msra.mxu3 %v1546_v31  ;;  %v1598_v31 = vld [vmem:[%s2026_s1 + $0x260] sm:$0xff] }
  0x21   :  { %859 = vmatpush.bf16.msra.mxu1 %v1530_v37  ;;  %847 = vmatmul.bf16.vlgmr.msra.gmra.mxu0 %v34_v40  ;;  %v1604_v37 = vld [vmem:[%s2026_s1 + $0x290] sm:$0xff]  ;;  %v1587_v40 = vld [vmem:[%s2026_s1 + $0x208] sm:$0xff] }
  0x22   :  { %891 = vmatpush.bf16.msrb.mxu0 %v1561_v32  ;;  %873 = vmatmul.bf16.vlgmr.msra.gmra.mxu2 %v36_v38  ;;  %v1589_v32 = vld [vmem:[%s2026_s1 + $0x218] sm:$0xff]  ;;  %v1612_v38 = vld [vmem:[%s2026_s1 + $0x2d0] sm:$0xff] }
  0x23   :  { %917 = vmatpush.bf16.msrb.mxu2 %v1577_v34  ;;  %886 = vmatmul.bf16.vlgmr.msra.gmra.mxu3 %v37_v43  ;;  %v1613_v34 = vld [vmem:[%s2026_s1 + $0x2d8] sm:$0xff]  ;;  %v1595_v43 = vld [vmem:[%s2026_s1 + $0x248] sm:$0xff] }
  0x24   :  { %930 = vmatpush.bf16.msrb.mxu3 %v1585_v35  ;;  %860 = vmatmul.bf16.vlgmr.msra.gmra.mxu1 %v35_v46  ;;  %v1597_v35 = vld [vmem:[%s2026_s1 + $0x258] sm:$0xff]  ;;  %v29_v46 = vld [vmem:[%s2028_s0 + $0x40] sm:$0xff] }
  0x25   :  { %904 = vmatpush.bf16.msrb.mxu1 %v1569_v39  ;;  %v1596_v39 = vld [vmem:[%s2026_s1 + $0x250] sm:$0xff] }
  0x26   :  { %892 = vmatpush.bf16.msrb.mxu0 %v1560_v42  ;;  %v1611_v42 = vld [vmem:[%s2026_s1 + $0x2c8] sm:$0xff] }
  0x27   :  { %918 = vmatpush.bf16.msrb.mxu2 %v1576_v44  ;;  %v1586_v44 = vld [vmem:[%s2026_s1 + $0x200] sm:$0xff] }
  0x28   :  { %931 = vmatpush.bf16.msrb.mxu3 %v1584_v45  ;;  %v1602_v45 = vld [vmem:[%s2026_s1 + $0x280] sm:$0xff] }
  0x29   :  { %905 = vmatpush.bf16.msrb.mxu1 %v1568_v47  ;;  %v31_v47 = vld [vmem:[%s2028_s0 + $0x50] sm:$0xff] }
  0x2a   :  { %893 = vmatpush.bf16.msrb.mxu0 %v1559_v48  ;;  %v1610_v48 = vld [vmem:[%s2026_s1 + $0x2c0] sm:$0xff] }
  0x2b   :  { %919 = vmatpush.bf16.msrb.mxu2 %v1575_v49  ;;  %v32_v49 = vld [vmem:[%s2028_s0 + $0x58] sm:$0xff] }
  0x2c   :  { %932 = vmatpush.bf16.msrb.mxu3 %v1583_v50  ;;  %v1619_v50 = vld [vmem:[%s2026_s1 + $0x308] sm:$0xff] }
  0x2d   :  { %906 = vmatpush.bf16.msrb.mxu1 %v1567_v51  ;;  %v1594_v51 = vld [vmem:[%s2026_s1 + $0x240] sm:$0xff] }
  0x2e   :  { %894 = vmatpush.bf16.msrb.mxu0 %v1558_v52  ;;  %v30_v52 = vld [vmem:[%s2028_s0 + $0x48] sm:$0xff] }
  0x2f   :  { %920 = vmatpush.bf16.msrb.mxu2 %v1574_v53  ;;  %v42_v53 = vpack.c.bf16 %v29_v46, %v29_v46  ;;  %v1629_v46 = vld [vmem:[%s2029_s4] ss:$0 sm:$0xff] }
  0x30   :  { %933 = vmatpush.bf16.msrb.mxu3 %v1582_v54  ;;  %v44_v54 = vpack.c.bf16 %v31_v47, %v31_v47 }
  0x31   :  { %907 = vmatpush.bf16.msrb.mxu1 %v1566_v55  ;;  %v45_v55 = vpack.c.bf16 %v32_v49, %v32_v49 }
  0x32   :  { %895 = vmatpush.bf16.msrb.mxu0 %v1557_v56  ;;  %v43_v56 = vpack.c.bf16 %v30_v52, %v30_v52 }
  0x33   :  { %921 = vmatpush.bf16.msrb.mxu2 %v1573_v57  ;;  %v1618_v57 = vld [vmem:[%s2026_s1 + $0x300] sm:$0xff] }
  0x34   :  { %934 = vmatpush.bf16.msrb.mxu3 %v1581_v58  ;;  %v33_v58 = vld [vmem:[%s2028_s0 + $0x60] sm:$0xff] }
  0x35   :  { %908 = vmatpush.bf16.msrb.mxu1 %v1565_v59  ;;  %v46_v59 = vpack.c.bf16 %v33_v58, %v33_v58 }
  0x36   :  { %896 = vmatpush.bf16.msrb.mxu0 %v1556_v60 }
  0x37   :  { %922 = vmatpush.bf16.msrb.mxu2 %v1572_v61 }
  0x38   :  { %935 = vmatpush.bf16.msrb.mxu3 %v1580_v62 }
  0x39   :  { %909 = vmatpush.bf16.msrb.mxu1 %v1564_v63  ;;  %v1627_v63 = vld [vmem:[%s2030_s3 + $0x38] sm:$0xff] }
  0x3a   :  { %897 = vmatpush.bf16.msrb.mxu0 %v1555_v0 }
  0x3b   :  { %923 = vmatpush.bf16.msrb.mxu2 %v1571_v1 }
  0x3c   :  { %936 = vmatpush.bf16.msrb.mxu3 %v1579_v2 }
  0x3d   :  { %910 = vmatpush.bf16.msrb.mxu1 %v1563_v3  ;;  %v1626_v3 = vld [vmem:[%s2030_s3 + $0x30] sm:$0xff] }
  0x3e   :  { %898 = vmatpush.bf16.msrb.mxu0 %v1554_v4 }
  0x3f   :  { %924 = vmatpush.bf16.msrb.mxu2 %v1570_v5 }
  0x40   :  { %937 = vmatpush.bf16.msrb.mxu3 %v1578_v6  ;;  %v1625_v6 = vld [vmem:[%s2030_s3 + $0x28] sm:$0xff] }
  0x41   :  { %911 = vmatpush.bf16.msrb.mxu1 %v1562_v13  ;;  %899 = vmatmul.bf16.vlgmr.msrb.gmra.mxu0 %v38_v17 }
  0x42   :  { %943 = vmatpush.bf16.msra.mxu0 %v1593_v7  ;;  %925 = vmatmul.bf16.vlgmr.msrb.gmra.mxu2 %v40_v15  ;;  %v1628_v7 = vld [vmem:[%s2027_s2] ss:$0 sm:$0xff]  ;;  %v1622_v15 = vld [vmem:[%s2030_s3 + $0x10] sm:$0xff] }
  0x43   :  { %969 = vmatpush.bf16.msra.mxu2 %v1609_v9  ;;  %938 = vmatmul.bf16.vlgmr.msrb.gmra.mxu3 %v41_v18 }
  0x44   :  { %982 = vmatpush.bf16.msra.mxu3 %v1617_v12  ;;  %912 = vmatmul.bf16.vlgmr.msrb.gmra.mxu1 %v39_v22  ;;  %v1623_v12 = vld [vmem:[%s2030_s3 + $0x18] sm:$0xff] }
  0x45   :  { %956 = vmatpush.bf16.msra.mxu1 %v1601_v14 }
  0x46   :  { %944 = vmatpush.bf16.msra.mxu0 %v1592_v19 }
  0x47   :  { %970 = vmatpush.bf16.msra.mxu2 %v1608_v20  ;;  %v1621_v20 = vld [vmem:[%s2030_s3 + $0x8] sm:$0xff] }
  0x48   :  { %983 = vmatpush.bf16.msra.mxu3 %v1616_v21 }
  0x49   :  { %957 = vmatpush.bf16.msra.mxu1 %v1600_v23 }
  0x4a   :  { %945 = vmatpush.bf16.msra.mxu0 %v1591_v24  ;;  %v1620_v24 = vld [vmem:[%s2030_s3] sm:$0xff] }
  0x4b   :  { %971 = vmatpush.bf16.msra.mxu2 %v1607_v25 }
  0x4c   :  { %984 = vmatpush.bf16.msra.mxu3 %v1615_v26 }
  0x4d   :  { %958 = vmatpush.bf16.msra.mxu1 %v1599_v27 }
  0x4e   :  { %946 = vmatpush.bf16.msra.mxu0 %v1590_v28 }
  0x4f   :  { %972 = vmatpush.bf16.msra.mxu2 %v1606_v29 }
  0x50   :  { %985 = vmatpush.bf16.msra.mxu3 %v1614_v30 }
  0x51   :  { %959 = vmatpush.bf16.msra.mxu1 %v1598_v31 }
  0x52   :  { %947 = vmatpush.bf16.msra.mxu0 %v1589_v32 }
  0x53   :  { %973 = vmatpush.bf16.msra.mxu2 %v1605_v33 }
  0x54   :  { %986 = vmatpush.bf16.msra.mxu3 %v1613_v34 }
  0x55   :  { %960 = vmatpush.bf16.msra.mxu1 %v1597_v35 }
  0x56   :  { %948 = vmatpush.bf16.msra.mxu0 %v1588_v36 }
  0x57   :  { %974 = vmatpush.bf16.msra.mxu2 %v1604_v37 }
  0x58   :  { %987 = vmatpush.bf16.msra.mxu3 %v1612_v38 }
  0x59   :  { %961 = vmatpush.bf16.msra.mxu1 %v1596_v39 }
  0x5a   :  { %949 = vmatpush.bf16.msra.mxu0 %v1587_v40 }
  0x5b   :  { %975 = vmatpush.bf16.msra.mxu2 %v1603_v41 }
  0x5c   :  { %988 = vmatpush.bf16.msra.mxu3 %v1611_v42 }
  0x5d   :  { %962 = vmatpush.bf16.msra.mxu1 %v1595_v43 }
  0x5e   :  { %950 = vmatpush.bf16.msra.mxu0 %v1586_v44 }
  0x5f   :  { %976 = vmatpush.bf16.msra.mxu2 %v1602_v45 }
  0x60   :  { %989 = vmatpush.bf16.msra.mxu3 %v1610_v48 }
  0x61   :  { %963 = vmatpush.bf16.msra.mxu1 %v1594_v51  ;;  %951 = vmatmul.bf16.vlgmr.msra.gmra.mxu0 %v42_v53 }
  0x62   :  { %1001 = vmatpush.bf16.msrb.mxu0 %v1619_v50  ;;  %977 = vmatmul.bf16.vlgmr.msra.gmra.mxu2 %v44_v54 }
  0x63   :  { %990 = vmatmul.bf16.vlgmr.msra.gmra.mxu3 %v45_v55 }
  0x64   :  { %964 = vmatmul.bf16.vlgmr.msra.gmra.mxu1 %v43_v56 }
  0x65   :  { %1078 = vmatpush.bf16.msrb.mxu1 %v1627_v63 }
  0x66   :  { %1002 = vmatpush.bf16.msrb.mxu0 %v1618_v57 }
  0x69   :  { %1079 = vmatpush.bf16.msrb.mxu1 %v1626_v3 }
  0x6d   :  { %1080 = vmatpush.bf16.msrb.mxu1 %v1625_v6 }
  0x71   :  { %1489 = vmatmul.msk.bf16.vlgmr.msrb.gmra.mxu0 %vm835_vm0, %v46_v59  ;;  %1081 = vmatpush.bf16.msrb.mxu1 %v1624_v8 }
  0x75   :  { %1082 = vmatpush.bf16.msrb.mxu1 %v1623_v12 }
  0x79   :  { %1083 = vmatpush.bf16.msrb.mxu1 %v1622_v15 }
  0x7d   :  { %1084 = vmatpush.bf16.msrb.mxu1 %v1621_v20 }
  0x81   :  { %1085 = vmatpush.bf16.msrb.mxu1 %v1620_v24 }
  0x9e   :  { %v848_v60 = vpop.f32.mrf.mxu0 }
  0x9f   :  { %v849_v11 = vadd.f32 %v1628_v7, %v848_v60 }
  0xa1   :  { %v861_v61 = vpop.f32.mrf.mxu1 }
  0xa2   :  { %v862_v16 = vadd.f32 %v861_v61, %v849_v11 }
  0xa5   :  { %v874_v62 = vpop.f32.mrf.mxu2 }
  0xa6   :  { %v887_v0 = vpop.f32.mrf.mxu3  ;;  %v850_v1 = vpop.f32.mrf.mxu0  ;;  %v875_v19 = vadd.f32 %v874_v62, %v862_v16 }
  0xa8   :  { %v888_v23 = vadd.f32 %v887_v0, %v875_v19 }
  0xa9   :  { %v863_v2 = vpop.f32.mrf.mxu1 }
  0xad   :  { %v876_v4 = vpop.f32.mrf.mxu2 }
  0xae   :  { %v889_v5 = vpop.f32.mrf.mxu3 }
  0xbe   :  { %v900_v9 = vpop.f32.mrf.mxu0 }
  0xbf   :  { %v901_v25 = vadd.f32 %v900_v9, %v888_v23 }
  0xc1   :  { %v913_v10 = vpop.f32.mrf.mxu1 }
  0xc2   :  { %v914_v26 = vadd.f32 %v913_v10, %v901_v25 }
  0xc5   :  { %v926_v13 = vpop.f32.mrf.mxu2 }
  0xc6   :  { %v939_v14 = vpop.f32.mrf.mxu3  ;;  %v902_v17 = vpop.f32.mrf.mxu0  ;;  %v927_v27 = vadd.f32 %v926_v13, %v914_v26 }
  0xc8   :  { %v940_v30 = vadd.f32 %v939_v14, %v927_v27 }
  0xc9   :  { %v915_v18 = vpop.f32.mrf.mxu1 }
  0xcd   :  { %v928_v21 = vpop.f32.mrf.mxu2 }
  0xce   :  { %v941_v22 = vpop.f32.mrf.mxu3 }
  0xde   :  { %v952_v28 = vpop.f32.mrf.mxu0 }
  0xdf   :  { %v953_v31 = vadd.f32 %v952_v28, %v940_v30 }
  0xe1   :  { %v965_v29 = vpop.f32.mrf.mxu1 }
  0xe2   :  { %v966_v35 = vadd.f32 %v965_v29, %v953_v31 }
  0xe5   :  { %v978_v32 = vpop.f32.mrf.mxu2 }
  0xe6   :  { %v991_v33 = vpop.f32.mrf.mxu3  ;;  %v954_v34 = vpop.f32.mrf.mxu0  ;;  %v979_v37 = vadd.f32 %v978_v32, %v966_v35 }
  0xe8   :  { %v992_v39 = vadd.f32 %v991_v33, %v979_v37 }
  0xe9   :  { %v967_v36 = vpop.f32.mrf.mxu1 }
  0xed   :  { %v980_v38 = vpop.f32.mrf.mxu2 }
  0xee   :  { %v993_v40 = vpop.f32.mrf.mxu3  ;;  %v1004_v41 = vpop.f32.mrf.mxu0 }
  0xef   :  { %v1005_v42 = vadd.f32 %v1004_v41, %v992_v39 }
  0xf1   :  { %v1008_v43 = vmax.f32 %v1005_v42, 0.0 }
  0xf3   :  { %v1009_v44 = vpack.c.bf16 %v1008_v43, %v1008_v43 }
  0xf5   :  { %1086 = vmatmul.bf16.vlgmr.msrb.gmra.mxu1 %v1009_v44 }
  0xf6   :  { %v1006_v45 = vpop.f32.mrf.mxu0 }
 0x172   :  { %v1087_v47 = vpop.f32.mrf.mxu1 }
 0x173   :  { %v1088_v48 = vadd.f32 %v1629_v46, %v1087_v47 }
 0x175   :  { %1092 = vst.msk [vmem:[%s2031_s5] sm:$0xff] %vm1091_vm1, %v1088_v48 }
 0x17a   :  { %v1089_v49 = vpop.f32.mrf.mxu1 }

</bundles_post_ra>
